<compile_context>
chip_gen: v5e
topology: v5e:2x2
jax: 0.10.0
libtpu: 0.0.40
codegen_flags: <defaults>
</compile_context>

<pallas_src>
import jax
import jax.numpy as jnp
from jax.experimental import pallas as pl
from jax.experimental.pallas import tpu as pltpu


def _clip_loss_kernel(txt_ref, img_ref, out_ref):
    TM, _ = txt_ref.shape
    i = pl.program_id(0)
    # Column offset of the TM x TM diagonal sub-block owned by this row tile.
    col0 = pl.multiple_of(i * TM, TM)

    # (TM, TM) diagonal mask: the local target column of local row r is r.
    row = jax.lax.broadcasted_iota(jnp.int32, (TM, TM), 0)
    col = jax.lax.broadcasted_iota(jnp.int32, (TM, TM), 1)
    diag = row == col

    def partial_ce_sum(ref):
        x = ref[...].astype(jnp.float32)                              # (TM, B)
        # Numerically stable per-row log-sum-exp (exp/log on EUP, hidden under DMA).
        m = jnp.max(x, axis=-1, keepdims=True)                        # (TM, 1)
        lse = m + jnp.log(jnp.sum(jnp.exp(x - m), axis=-1, keepdims=True))
        # Target logit x[global_row, global_row]: diagonal of the TM x TM block.
        sub = ref[:, pl.ds(col0, TM)].astype(jnp.float32)             # (TM, TM)
        tgt = jnp.sum(jnp.where(diag, sub, jnp.float32(0.0)), axis=-1, keepdims=True)
        return jnp.sum(lse - tgt)                                     # scalar partial

    total = partial_ce_sum(img_ref) + partial_ce_sum(txt_ref)
    # Lane-dense broadcast store of the per-block partial sum.
    out_ref[...] = jnp.full(out_ref.shape, total, dtype=jnp.float32)


def _choose_row_tile(batch, itemsize):
    # Keep 2 inputs x 2 pipeline buffers x (TM x B) under ~8 MiB of VMEM tile
    # traffic so it fits comfortably on every generation (incl. v7x's 64 MiB).
    budget = 8 * 1024 * 1024
    cap = max(8, budget // (4 * batch * itemsize))
    for tm in (512, 256, 128, 64, 32, 16, 8):
        if tm <= cap and batch % tm == 0:
            return tm
    return batch  # odd batch sizes: single full-height block (block == array dims)


def clip_loss(txt_log, img_log, *, row_tile=None):
    """Pallas implementation of CLIPLoss.forward(txt_log, img_log) -> scalar."""
    assert txt_log.shape == img_log.shape
    assert txt_log.ndim == 2 and txt_log.shape[0] == txt_log.shape[1]
    batch = txt_log.shape[0]
    tm = row_tile if row_tile is not None else _choose_row_tile(
        batch, jnp.dtype(txt_log.dtype).itemsize)
    assert batch % tm == 0, (batch, tm)
    nb = batch // tm

    # 2 inputs x 2 pipeline buffers per row tile, plus small headroom.
    tile_bytes = 2 * 2 * tm * batch * jnp.dtype(txt_log.dtype).itemsize
    vmem_limit = int(min(64 * 1024 * 1024, max(16 * 1024 * 1024, 2 * tile_bytes)))

    partials = pl.pallas_call(
        _clip_loss_kernel,
        out_shape=jax.ShapeDtypeStruct((nb, 8, 128), jnp.float32),
        grid=(nb,),
        in_specs=[
            pl.BlockSpec((tm, batch), lambda i: (i, 0)),
            pl.BlockSpec((tm, batch), lambda i: (i, 0)),
        ],
        out_specs=pl.BlockSpec((1, 8, 128), lambda i: (i, 0, 0)),
        compiler_params=pltpu.CompilerParams(
            dimension_semantics=("parallel",),
            vmem_limit_bytes=vmem_limit,
        ),
    )(txt_log, img_log)

    # Tiny final reduction of per-block partial sums + mean / average of the two CEs.
    return jnp.sum(partials[:, 0, 0]) / (2.0 * batch)


def _reference_clip_loss(txt_log, img_log):
    # Pure-JAX reference mirroring torch.nn.CrossEntropyLoss(mean) semantics.
    def ce(x):
        x = x.astype(jnp.float32)
        logp = jax.nn.log_softmax(x, axis=-1)
        return -jnp.mean(jnp.diagonal(logp))

    return (ce(img_log) + ce(txt_log)) * 0.5


if __name__ == "__main__":
    B = 256  # CLIP contrastive logits are [B, B]
    key = jax.random.PRNGKey(0)
    k_txt, k_img = jax.random.split(key)
    txt_log = jax.random.normal(k_txt, (B, B), dtype=jnp.float32)
    img_log = jax.random.normal(k_img, (B, B), dtype=jnp.float32)

    # row_tile=128 -> a 2-step grid, exercising the pipelined / parallel path.
    loss = jax.block_until_ready(clip_loss(txt_log, img_log, row_tile=128))

    ref = _reference_clip_loss(txt_log, img_log)
    assert jnp.allclose(loss, ref, atol=1e-5, rtol=1e-5), (loss, ref)

    print("KERNEL_OK")
</pallas_src>

<mosaic_0001>
module attributes {stable_mosaic.version = 11 : i64} {
  func.func @_clip_loss_kernel(%arg0: i32, %arg1: memref<128x256xf32, #tpu.memory_space<vmem>>, %arg2: memref<128x256xf32, #tpu.memory_space<vmem>>, %arg3: memref<1x8x128xf32, #tpu.memory_space<vmem>>) attributes {dimension_semantics = [#tpu.dimension_semantics<parallel>], iteration_bounds = array<i64: 2>, scalar_prefetch = 0 : i64, scratch_operands = 0 : i64, tpu.core_type = #tpu.core_type<tc>, window_params = [{transform_indices = @transform_0, window_bounds = array<i64: 128, 256>}, {transform_indices = @transform_1, window_bounds = array<i64: 128, 256>}, {transform_indices = @transform_2, window_bounds = array<i64: 1, 8, 128>}]} {
    %c128_i32 = arith.constant 128 : i32
    %0 = arith.muli %arg0, %c128_i32 : i32
    %1 = tpu.assume_multiple %0, 128 : i32
    %2 = tpu.iota {dimensions = array<i32: 0>} : vector<128x128xi32>
    %3 = tpu.iota {dimensions = array<i32: 1>} : vector<128x128xi32>
    %4 = arith.cmpi eq, %2, %3 : vector<128x128xi32>
    %c0 = arith.constant 0 : index
    %c0_0 = arith.constant 0 : index
    %5 = vector.load %arg2[%c0, %c0_0] : memref<128x256xf32, #tpu.memory_space<vmem>>, vector<128x256xf32>
    %cst = arith.constant dense<0xFF800000> : vector<128xf32>
    %6 = vector.multi_reduction <maximumf>, %5, %cst [1] : vector<128x256xf32> to vector<128xf32>
    %7 = vector.shape_cast %6 : vector<128xf32> to vector<128x1xf32>
    %8 = vector.broadcast %7 : vector<128x1xf32> to vector<128x256xf32>
    %9 = arith.subf %5, %8 : vector<128x256xf32>
    %10 = math.exp %9 : vector<128x256xf32>
    %cst_1 = arith.constant dense<0.000000e+00> : vector<128xf32>
    %11 = vector.multi_reduction <add>, %10, %cst_1 [1] : vector<128x256xf32> to vector<128xf32>
    %12 = vector.shape_cast %11 : vector<128xf32> to vector<128x1xf32>
    %13 = math.log %12 : vector<128x1xf32>
    %14 = arith.addf %7, %13 : vector<128x1xf32>
    %c0_2 = arith.constant 0 : index
    %15 = arith.index_cast %1 : i32 to index
    %16 = vector.load %arg2[%c0_2, %15] : memref<128x256xf32, #tpu.memory_space<vmem>>, vector<128x128xf32>
    %cst_3 = arith.constant 0.000000e+00 : f32
    %17 = vector.broadcast %cst_3 : f32 to vector<128x128xf32>
    %18 = arith.select %4, %16, %17 : vector<128x128xi1>, vector<128x128xf32>
    %cst_4 = arith.constant dense<0.000000e+00> : vector<128xf32>
    %19 = vector.multi_reduction <add>, %18, %cst_4 [1] : vector<128x128xf32> to vector<128xf32>
    %20 = vector.shape_cast %19 : vector<128xf32> to vector<128x1xf32>
    %21 = arith.subf %14, %20 : vector<128x1xf32>
    %22 = vector.shape_cast %21 : vector<128x1xf32> to vector<1x128x1xf32>
    %cst_5 = arith.constant dense<0.000000e+00> : vector<1xf32>
    %23 = vector.multi_reduction <add>, %22, %cst_5 [1, 2] : vector<1x128x1xf32> to vector<1xf32>
    %24 = vector.shape_cast %23 : vector<1xf32> to vector<1x1x1xf32>
    %25 = vector.extract %24[0, 0, 0] : f32 from vector<1x1x1xf32>
    %c0_6 = arith.constant 0 : index
    %c0_7 = arith.constant 0 : index
    %26 = vector.load %arg1[%c0_6, %c0_7] : memref<128x256xf32, #tpu.memory_space<vmem>>, vector<128x256xf32>
    %cst_8 = arith.constant dense<0xFF800000> : vector<128xf32>
    %27 = vector.multi_reduction <maximumf>, %26, %cst_8 [1] : vector<128x256xf32> to vector<128xf32>
    %28 = vector.shape_cast %27 : vector<128xf32> to vector<128x1xf32>
    %29 = vector.broadcast %28 : vector<128x1xf32> to vector<128x256xf32>
    %30 = arith.subf %26, %29 : vector<128x256xf32>
    %31 = math.exp %30 : vector<128x256xf32>
    %cst_9 = arith.constant dense<0.000000e+00> : vector<128xf32>
    %32 = vector.multi_reduction <add>, %31, %cst_9 [1] : vector<128x256xf32> to vector<128xf32>
    %33 = vector.shape_cast %32 : vector<128xf32> to vector<128x1xf32>
    %34 = math.log %33 : vector<128x1xf32>
    %35 = arith.addf %28, %34 : vector<128x1xf32>
    %c0_10 = arith.constant 0 : index
    %36 = arith.index_cast %1 : i32 to index
    %37 = vector.load %arg1[%c0_10, %36] : memref<128x256xf32, #tpu.memory_space<vmem>>, vector<128x128xf32>
    %cst_11 = arith.constant 0.000000e+00 : f32
    %38 = vector.broadcast %cst_11 : f32 to vector<128x128xf32>
    %39 = arith.select %4, %37, %38 : vector<128x128xi1>, vector<128x128xf32>
    %cst_12 = arith.constant dense<0.000000e+00> : vector<128xf32>
    %40 = vector.multi_reduction <add>, %39, %cst_12 [1] : vector<128x128xf32> to vector<128xf32>
    %41 = vector.shape_cast %40 : vector<128xf32> to vector<128x1xf32>
    %42 = arith.subf %35, %41 : vector<128x1xf32>
    %43 = vector.shape_cast %42 : vector<128x1xf32> to vector<1x128x1xf32>
    %cst_13 = arith.constant dense<0.000000e+00> : vector<1xf32>
    %44 = vector.multi_reduction <add>, %43, %cst_13 [1, 2] : vector<1x128x1xf32> to vector<1xf32>
    %45 = vector.shape_cast %44 : vector<1xf32> to vector<1x1x1xf32>
    %46 = vector.extract %45[0, 0, 0] : f32 from vector<1x1x1xf32>
    %47 = arith.addf %25, %46 : f32
    %48 = vector.broadcast %47 : f32 to vector<1x8x128xf32>
    %c0_14 = arith.constant 0 : index
    %c0_15 = arith.constant 0 : index
    %c0_16 = arith.constant 0 : index
    %49 = vector.load %arg3[%c0_14, %c0_15, %c0_16] : memref<1x8x128xf32, #tpu.memory_space<vmem>>, vector<1x8x128xf32>
    tpu.vector_store %arg3[%c0_14, %c0_15, %c0_16], %48 {strides = array<i32>} : memref<1x8x128xf32, #tpu.memory_space<vmem>>, vector<1x8x128xf32>,
    return
  }
  func.func @transform_0(%arg0: i32) -> (i32, i32) {
    %c0_i32 = arith.constant 0 : i32
    %c0_i32_0 = arith.constant 0 : i32
    return %arg0, %c0_i32 : i32, i32
  }
  func.func @transform_1(%arg0: i32) -> (i32, i32) {
    %c0_i32 = arith.constant 0 : i32
    %c0_i32_0 = arith.constant 0 : i32
    return %arg0, %c0_i32 : i32, i32
  }
  func.func @transform_2(%arg0: i32) -> (i32, i32, i32) {
    %c0_i32 = arith.constant 0 : i32
    %c0_i32_0 = arith.constant 0 : i32
    %c0_i32_1 = arith.constant 0 : i32
    return %arg0, %c0_i32, %c0_i32_0 : i32, i32, i32
  }
}

</mosaic_0001>

<bundles_post_ra>
// kernel: tpu_custom_call.1
= control target key start
LH: loop header
LB: loop body
LE: loop exit
PB: predicated region body
PF: predicated region fallthrough
CT: control target
= control target key end

     0   :  { %7 = vsyncpa [#allocation3], 0  ;;  %s2494_s0 = inlined_call_operand.hbm [shape: f32[256,256], index: 0, kind: input, shape index: {}]   ;;  %s2495_s1 = inlined_call_operand.hbm [shape: f32[256,256], index: 1, kind: input, shape index: {}]   ;;  %s2496_s2 = inlined_call_operand.hbm [shape: f32[2,8,128], index: 2, kind: output, shape index: {}]  }
   0x1   :  { %9 = vsyncpa [#allocation3 + $0x1], 0 }
   0x2   :  { %10 = vsyncpa [#allocation6], 0 }
   0x3   :  { %12 = vsyncpa [#allocation6 + $0x1], 0 }
   0x4   :  { %13 = vsyncpa [#allocation4], 0 }
   0x5   :  { %15 = vsyncpa [#allocation4 + $0x1], 0  ;;  %s1577_s9 = smov 0   ;;  %s1579_s10 = smov 0  }
   0x6   :  { %s1581_s11 = smov 0   ;;  %s1583_s12 = smov 0  }
   0x7 LB: > { %s1598_s13 = sadd.s32 4294967295, %s1558_s12   ;;  %s1153_s14 = sadd.s32 4294967294, %s1558_s12   ;;  %s1558_s12 = sphi %s1583_s12, %s2582_s12   ;;  %s1554_s11 = sphi %s1581_s11, %s2581_s11   ;;  %s1550_s10 = sphi %s1579_s10, %s2580_s10   ;;  %s1546_s9 = sphi %s1577_s9, %s2579_s9  }
   0x8   : > { %s1602_s15 = sadd.s32 1, %s1558_s12   ;;  %s28_s16 = sadd.s32 1, %s1554_s11 }
   0x9   : > { %s25_s17 = ssub.s32 %s1558_s12, %s1602_s15  ;;  %p35_p0 = scmp.ne.s32.totalorder %s1554_s11, %s1550_s10 }
   0xa   : > { %p26_p1 = scmp.eq.s32.totalorder %s25_s17, 0  ;;  %p36_p2 = scmp.eq.s32.totalorder %s1558_s12, 0 }
   0xb   : > { %p41_p3 = scmp.ne.s32.totalorder %s1550_s10, %s1546_s9  ;;  %p42_p4 = scmp.eq.s32.totalorder %s1598_s13, 0 }
   0xc   : > { %s1614_s18 = scalar_select %p26_p1, %s1554_s11, %s28_s16  }
   0xd   : > { %p1616_p5 = por %p36_p2, %p35_p0  ;;  %p1620_p6 = por %p42_p4, %p41_p3 }
   0xe   : > { %p91_p7 = scmp.eq.s32.totalorder %s1598_s13, 1  ;;  %p97_p8 = scmp.eq.s32.totalorder %s1153_s14, 1 }
   0xf   : > { %p1200_p10 = scmp.lt.s32.totalorder %s1558_s12, 2  ;;  %s1636_s23 = sand.u32 1, %s1554_s11  }
  0x10   : > { %p1627_p11 = por %p91_p7, %p35_p0  ;;  %p1631_p12 = por %p97_p8, %p41_p3 }
  0x11   : > { %s1176_s24 = sshll.u32 %s1558_s12, 8  ;;  %s1156_s25 = sshll.u32 %s1636_s23, 8 }
  0x12   : > { %s127_s28 = scalar_lea.hbm %s2494_s0, %s1176_s24  ;;  %s121_s30 = scalar_lea.vmem [#allocation2], %s1156_s25 }
  0x13   : > { %s128_s29 = sshll.u32 %s127_s28, 4  ;;  %s130_s3 = sshll.u32 %s121_s30, 4  ;;  %s129_s29 = int_to_ptr.hbm [resolvable:$true] %s128_s29  ;;  %s131_s3 = int_to_ptr.vmem [resolvable:$true] %s130_s3 }
  0x14   : > { %p1649_p13 = pnand %p1200_p10, %p1616_p5  ;;  %p1164_p0 = scmp.ge.s32.totalorder %s1558_s12, 1 }
  0x15   : > { %p161_p1 = scmp.lt.s32.totalorder %s1558_s12, 3  ;;  %s118_s5 = scalar_lea.sflag [#allocation3], %s1636_s23 }
  0x16   : > { %s1428_s6 = sshra.s32 %s129_s29, 4  ;;  %p1432_p3 = pneg %p1649_p13  ;;  %s1429_s6 = int_to_ptr.hbm [resolvable:$true] %s1428_s6 }
  0x17   : > { %s1430_s7 = scalar_lea.hbm %s1429_s6, 256  ;;  %s1435_s16 = scalar_lea.hbm %s2494_s0, 512 }
  0x18   : > { %p1431_p2 = scmp.ne.s32.totalorder %s1429_s6, %s1430_s7  ;;  %p1436_p5 = scmp.lt.s32.totalorder %s1429_s6, %s2494_s0 }
  0x19   : > { %p1437_p8 = scmp.lt.s32.totalorder %s1435_s16, %s1430_s7 }
  0x1a   : > { %p1433_p4 = pnand %p1432_p3, %p1431_p2 }
  0x1b   : > { %p1438_p10 = por %p1437_p8, %p1436_p5 }
  0x1c   : > { %p1434_p7 = pneg %p1433_p4 }
  0x1e   : > { %p1439_p9 = pnand %p1438_p10, %p1434_p7 }
  0x20   : > { %1442 = shalt.err (!%p1439_p9)
}
  0x21   : > { %s1560_s26 = smov 256   ;;  %s1561_s27 = smov 16  }
  0x22   : > { %1192 = dma.hbm_to_vmem [thread:$0]  (!%p1649_p13), %s129_s29, 4096, %s131_s3, %s118_s5, %s1560_s26, %s1560_s26, %s1561_s27  }
  0x23   : > { %p1673_p2 = pnand %p1164_p0, %p161_p1  ;;  %s150_s7 = scalar_lea.hbm %s2495_s1, %s1176_s24 }
  0x24   : > { %s151_s8 = sshll.u32 %s150_s7, 4  ;;  %s144_s14 = scalar_lea.vmem [#allocation5], %s1156_s25  ;;  %s152_s8 = int_to_ptr.hbm [resolvable:$true] %s151_s8 }
  0x25   : > { %s153_s16 = sshll.u32 %s144_s14, 4  ;;  %s141_s17 = scalar_lea.sflag [#allocation6], %s1636_s23  ;;  %s154_s16 = int_to_ptr.vmem [resolvable:$true] %s153_s16 }
  0x26   : > { %s1458_s19 = sshra.s32 %s152_s8, 4  ;;  %s1465_s30 = scalar_lea.hbm %s2495_s1, 512  ;;  %s1459_s19 = int_to_ptr.hbm [resolvable:$true] %s1458_s19 }
  0x27   : > { %s1460_s29 = scalar_lea.hbm %s1459_s19, 256  ;;  %p1466_p4 = scmp.lt.s32.totalorder %s1459_s19, %s2495_s1 }
  0x28   : > { %p1461_p9 = scmp.ne.s32.totalorder %s1459_s19, %s1460_s29  ;;  %p1467_p7 = scmp.lt.s32.totalorder %s1465_s30, %s1460_s29 }
  0x2a   : > { %p1463_p0 = pnand %p1461_p9, %p1432_p3  ;;  %p1468_p5 = por %p1467_p7, %p1466_p4 }
  0x2c   : > { %p1464_p1 = pneg %p1463_p0 }
  0x2e   : > { %p1469_p8 = pnand %p1468_p5, %p1464_p1 }
  0x30   : > { %1472 = shalt.err (!%p1469_p8)
}
  0x31   : > { %1195 = dma.hbm_to_vmem [thread:$0]  (!%p1649_p13), %s152_s8, 4096, %s154_s16, %s141_s17, %s1560_s26, %s1560_s26, %s1561_s27  }
  0x32   : > { %165 = sbr.rel (%p1673_p2) target bundleno = 695 (0x2b7), region = 28 }
  0x37   : > { %s1699_s23 = sand.u32 1, %s1550_s10  }
  0x38   : > { %s1165_s25 = sshll.u32 %s1699_s23, 8  ;;  %s168_s7 = scalar_lea.sflag [#allocation3], %s1699_s23 }
  0x39   : > { %s1703_s14 = scalar_lea.vmem [#allocation2], %s1165_s25 }
  0x3a   : > { %1533 = dma.done.wait (%p1620_p6), %s168_s7, 4096  }
  0x3b   : > { %1535 = vsyncadd (%p1620_p6), %s168_s7, 4294963200  ;;  %s178_s4 = scalar_lea.sflag [#allocation6], %s1699_s23  ;;  %s1710_s26 = scalar_lea.vmem [#allocation5], %s1165_s25 }
  0x3c   : > { %1537 = dma.done.wait (%p1620_p6), %s178_s4, 4096  }
  0x3d   : > { %1539 = vsyncadd (%p1620_p6), %s178_s4, 4294963200  ;;  %v1717_v0 = vld [vmem:[%s1710_s26 + $0x40] sm:$0xff]  ;;  %v1720_v1 = vld [vmem:[%s1710_s26 + $0x48] sm:$0xff]  ;;  %s1168_s20 = sshll.u32 %s1598_s13, 7  ;;  %vm602_vm9 = vcmask 7168   ;;  %s1167_s17 = sshll.u32 %s1699_s23, 3 }
  0x3e   : > { %v1723_v2 = vld [vmem:[%s1710_s26 + $0x20] sm:$0xff]  ;;  %v290_v3 = vmax.f32 %v1717_v0, %v1720_v1  ;;  %v1728_v4 = vld [vmem:[%s1710_s26 + $0x28] sm:$0xff]  ;;  %v1741_v9 = vld [vmem:[%s1710_s26 + $0x50] sm:$0xff]  ;;  %s518_s27 = sshra.s32 %s1168_s20, 7  ;;  %s1172_s19 = sshll.u32 %s1598_s13, 3 }
  0x3f   : > { %v1731_v5 = vld [vmem:[%s1710_s26] sm:$0xff]  ;;  %v1734_v6 = vld [vmem:[%s1710_s26 + $0x8] sm:$0xff]  ;;  %v284_v7 = vmax.f32 %v1723_v2, %v1728_v4  ;;  %v1744_v10 = vld [vmem:[%s1710_s26 + $0x58] sm:$0xff]  ;;  %s1169_s28 = sshll.u32 %s518_s27, 3  ;;  %s1051_s5 = scalar_lea.hbm %s2496_s2, %s1172_s19 }
  0x40   : > { %v278_v8 = vmax.f32 %v1731_v5, %v1734_v6  ;;  %291 = vmax.xlane.f32.xlu2 %v290_v3  ;;  %v1747_v11 = vld [vmem:[%s1710_s26 + $0x30] sm:$0xff]  ;;  %v1750_v12 = vld [vmem:[%s1710_s26 + $0x38] sm:$0xff]  ;;  %v293_v15 = vmax.f32 %v1741_v9, %v1744_v10  ;;  %v1765_v18 = vld [vmem:[%s1710_s26 + $0x80] sm:$0xff]  ;;  %s1954_s8 = scalar_lea.vmem %s1710_s26, %s1169_s28 [#allocation5]  ;;  %s1964_s16 = scalar_lea.vmem %s1703_s14, %s1169_s28 [#allocation2] }
  0x41   : > { %285 = vmax.xlane.f32.xlu1 %v284_v7  ;;  %v1753_v13 = vld [vmem:[%s1710_s26 + $0x10] sm:$0xff]  ;;  %v1756_v14 = vld [vmem:[%s1710_s26 + $0x18] sm:$0xff]  ;;  %v287_v16 = vmax.f32 %v1747_v11, %v1750_v12  ;;  %v1768_v19 = vld [vmem:[%s1710_s26 + $0x88] sm:$0xff]  ;;  %s207_s30 = scalar_lea.vmem [#allocation7], %s1167_s17  ;;  %s1055_s25 = sshll.u32 %s1051_s5, 4  ;;  %s1056_s25 = int_to_ptr.hbm [resolvable:$true] %s1055_s25 }
  0x42   : > { %279 = vmax.xlane.f32.xlu0 %v278_v8  ;;  %v281_v17 = vmax.f32 %v1753_v13, %v1756_v14  ;;  %v1771_v20 = vld [vmem:[%s1710_s26 + $0x70] sm:$0xff]  ;;  %v1774_v21 = vld [vmem:[%s1710_s26 + $0x78] sm:$0xff]  ;;  %v1777_v22 = vld [vmem:[%s1710_s26 + $0x60] sm:$0xff]  ;;  %v302_v24 = vmax.f32 %v1765_v18, %v1768_v19  ;;  %s1053_s24 = sshll.u32 %s207_s30, 4  ;;  %s1041_s4 = scalar_lea.sflag [#allocation4], %s1699_s23  ;;  %s1054_s24 = int_to_ptr.vmem [resolvable:$true] %s1053_s24 }
  0x43   : > { %v1780_v23 = vld [vmem:[%s1710_s26 + $0x68] sm:$0xff]  ;;  %v299_v25 = vmax.f32 %v1771_v20, %v1774_v21  ;;  %v1789_v27 = vld [vmem:[%s1710_s26 + $0xb0] sm:$0xff]  ;;  %v1792_v28 = vld [vmem:[%s1710_s26 + $0xb8] sm:$0xff]  ;;  %s1508_s28 = scalar_lea.hbm %s2496_s2, 16 }
  0x44   : > { %v296_v26 = vmax.f32 %v1777_v22, %v1780_v23  ;;  %2528 = vst [vmem:[#allocation11_spill] sm:$0xff] %v1789_v27  ;;  %v1795_v29 = vld [vmem:[%s1710_s26 + $0xa0] sm:$0xff]  ;;  %v1798_v30 = vld [vmem:[%s1710_s26 + $0xa8] sm:$0xff]  ;;  %v1801_v31 = vld [vmem:[%s1710_s26 + $0x90] sm:$0xff]  ;;  %v311_v33 = vmax.f32 %v1789_v27, %v1792_v28 }
  0x45   : > { %2529 = vst [vmem:[#allocation12_spill] sm:$0xff] %v1792_v28  ;;  %v1804_v32 = vld [vmem:[%s1710_s26 + $0x98] sm:$0xff]  ;;  %v308_v34 = vmax.f32 %v1795_v29, %v1798_v30  ;;  %v1813_v36 = vld [vmem:[%s1710_s26 + $0xe0] sm:$0xff]  ;;  %v1816_v37 = vld [vmem:[%s1710_s26 + $0xe8] sm:$0xff] }
  0x46   : > { %v305_v35 = vmax.f32 %v1801_v31, %v1804_v32  ;;  %2530 = vst [vmem:[#allocation13_spill] sm:$0xff] %v1813_v36  ;;  %v1819_v38 = vld [vmem:[%s1710_s26 + $0xd0] sm:$0xff]  ;;  %v1822_v39 = vld [vmem:[%s1710_s26 + $0xd8] sm:$0xff]  ;;  %v1825_v40 = vld [vmem:[%s1710_s26 + $0xc0] sm:$0xff]  ;;  %v320_v42 = vmax.f32 %v1813_v36, %v1816_v37 }
  0x47   : > { %2531 = vst [vmem:[#allocation14_spill] sm:$0xff] %v1816_v37  ;;  %v1828_v41 = vld [vmem:[%s1710_s26 + $0xc8] sm:$0xff]  ;;  %v317_v43 = vmax.f32 %v1819_v38, %v1822_v39  ;;  %v1837_v45 = vld [vmem:[%s1703_s14] sm:$0xff]  ;;  %v1849_v49 = vld [vmem:[%s1710_s26 + $0xf0] sm:$0xff] }
  0x48   : > { %294 = vmax.xlane.f32.xlu2 %v293_v15  ;;  %2532 = vst [vmem:[#allocation15_spill] sm:$0xff] %v1819_v38  ;;  %v314_v44 = vmax.f32 %v1825_v40, %v1828_v41  ;;  %v1840_v46 = vld [vmem:[%s1703_s14 + $0x8] sm:$0xff]  ;;  %v1843_v47 = vld [vmem:[%s1703_s14 + $0x20] sm:$0xff]  ;;  %v1852_v50 = vld [vmem:[%s1710_s26 + $0xf8] sm:$0xff]  ;;  %s1502_s26 = sshra.s32 %s1056_s25, 4  ;;  %s1503_s26 = int_to_ptr.hbm [resolvable:$true] %s1502_s26 }
  0x49   : > { %288 = vmax.xlane.f32.xlu1 %v287_v16  ;;  %2533 = vst [vmem:[#allocation16_spill] sm:$0xff] %v1822_v39  ;;  %v1846_v48 = vld [vmem:[%s1703_s14 + $0x28] sm:$0xff]  ;;  %v675_v51 = vmax.f32 %v1837_v45, %v1840_v46  ;;  %v323_v53 = vmax.f32 %v1849_v49, %v1852_v50  ;;  %v1861_v54 = vld [vmem:[%s1703_s14 + $0x10] sm:$0xff]  ;;  %v1867_v56 = vld [vmem:[%s1703_s14 + $0x38] sm:$0xff]  ;;  %s1504_s20 = scalar_lea.hbm %s1503_s26, 8  ;;  %p1509_p10 = scmp.lt.s32.totalorder %s1503_s26, %s2496_s2 }
  0x4a   : > { %282 = vmax.xlane.f32.xlu0 %v281_v17  ;;  %2534 = vst [vmem:[#allocation17_spill] sm:$0xff] %v1849_v49  ;;  %v681_v52 = vmax.f32 %v1843_v47, %v1846_v48  ;;  %v1864_v55 = vld [vmem:[%s1703_s14 + $0x30] sm:$0xff]  ;;  %v1870_v57 = vld [vmem:[%s1703_s14 + $0x18] sm:$0xff]  ;;  %v1885_v63 = vld [vmem:[%s1703_s14 + $0x40] sm:$0xff]  ;;  %p1505_p6 = scmp.ne.s32.totalorder %s1503_s26, %s1504_s20  ;;  %p1510_p2 = scmp.lt.s32.totalorder %s1508_s28, %s1504_s20 }
  0x4b   : > { %2535 = vst [vmem:[#allocation18_spill] sm:$0xff] %v1852_v50  ;;  %v1873_v58 = vld [vmem:[%s1703_s14 + $0x50] sm:$0xff]  ;;  %v1876_v59 = vld [vmem:[%s1703_s14 + $0x58] sm:$0xff]  ;;  %v684_v60 = vmax.f32 %v1864_v55, %v1867_v56  ;;  %v678_v61 = vmax.f32 %v1861_v54, %v1870_v57  ;;  %v1888_v3 = vld [vmem:[%s1703_s14 + $0x60] sm:$0xff] }
  0x4c   : > { %v690_v62 = vmax.f32 %v1873_v58, %v1876_v59  ;;  %v1891_v7 = vld [vmem:[%s1703_s14 + $0x68] sm:$0xff]  ;;  %v1897_v15 = vld [vmem:[%s1703_s14 + $0x80] sm:$0xff]  ;;  %v1983_v39 = vld [vmem:[%s1703_s14 + $0xd8] sm:$0xff]  ;;  %p1506_p13 = pnand %p1505_p6, %p1627_p11  ;;  %p1511_p9 = por %p1510_p2, %p1509_p10 }
  0x4d   : > { %v1894_v8 = vld [vmem:[%s1703_s14 + $0x48] sm:$0xff]  ;;  %v693_v17 = vmax.f32 %v1888_v3, %v1891_v7  ;;  %2542 = vst [vmem:[#allocation25_spill] sm:$0xff] %v1983_v39  ;;  %v1996_v28 = vld [vmem:[%s1703_s14 + $0xf0] sm:$0xff]  ;;  %v1999_v27 = vld [vmem:[%s1703_s14 + $0xf8] sm:$0xff] }
  0x4e   : > { %v1900_v16 = vld [vmem:[%s1703_s14 + $0x88] sm:$0xff]  ;;  %2543 = vst [vmem:[#allocation26_spill] sm:$0xff] %v1996_v28  ;;  %p1507_p3 = pneg %p1506_p13 }
  0x4f   : > { %v1974_v50 = vld [vmem:[%s1703_s14 + $0xc8] sm:$0xff]  ;;  %2544 = vst [vmem:[#allocation27_spill] sm:$0xff] %v1999_v27 }
  0x50   : > { %303 = vmax.xlane.f32.xlu2 %v302_v24  ;;  %v687_v24 = vmax.f32 %v1885_v63, %v1894_v8  ;;  %2540 = vst [vmem:[#allocation23_spill] sm:$0xff] %v1974_v50  ;;  %p1512_p0 = pnand %p1511_p9, %p1507_p3 }
  0x51   : > { %300 = vmax.xlane.f32.xlu1 %v299_v25  ;;  %v699_v25 = vmax.f32 %v1897_v15, %v1900_v16 }
  0x52   : > { %297 = vmax.xlane.f32.xlu0 %v296_v26  ;;  %v1909_v26 = vld [vmem:[%s1703_s14 + $0x70] sm:$0xff] }
  0x58   : > { %312 = vmax.xlane.f32.xlu2 %v311_v33  ;;  %v1912_v33 = vld [vmem:[%s1703_s14 + $0x90] sm:$0xff] }
  0x59   : > { %309 = vmax.xlane.f32.xlu1 %v308_v34  ;;  %v1915_v34 = vld [vmem:[%s1703_s14 + $0x98] sm:$0xff] }
  0x5a   : > { %306 = vmax.xlane.f32.xlu0 %v305_v35  ;;  %v1918_v35 = vld [vmem:[%s1703_s14 + $0x78] sm:$0xff] }
  0x60   : > { %321 = vmax.xlane.f32.xlu2 %v320_v42  ;;  %v1921_v42 = vld [vmem:[%s1703_s14 + $0xb0] sm:$0xff] }
  0x61   : > { %318 = vmax.xlane.f32.xlu1 %v317_v43  ;;  %v1924_v43 = vld [vmem:[%s1703_s14 + $0xb8] sm:$0xff] }
  0x62   : > { %315 = vmax.xlane.f32.xlu0 %v314_v44  ;;  %v702_v44 = vmax.f32 %v1912_v33, %v1915_v34 }
  0x68   : > { %676 = vmax.xlane.f32.xlu2 %v675_v51  ;;  %v696_v51 = vmax.f32 %v1909_v26, %v1918_v35 }
  0x69   : > { %682 = vmax.xlane.f32.xlu1 %v681_v52  ;;  %v708_v52 = vmax.f32 %v1921_v42, %v1924_v43 }
  0x6a   : > { %324 = vmax.xlane.f32.xlu0 %v323_v53  ;;  %v1934_v53 = vld [vmem:[%s1703_s14 + $0xe0] sm:$0xff] }
  0x6b   : > { %2536 = vst [vmem:[#allocation19_spill] sm:$0xff] %v1934_v53 }
  0x70   : > { %685 = vmax.xlane.f32.xlu2 %v684_v60  ;;  %v1937_v60 = vld [vmem:[%s1703_s14 + $0xe8] sm:$0xff] }
  0x71   : > { %691 = vmax.xlane.f32.xlu1 %v690_v62  ;;  %2537 = vst [vmem:[#allocation20_spill] sm:$0xff] %v1937_v60  ;;  %v1943_v62 = vld [vmem:[%s1703_s14 + $0xa8] sm:$0xff] }
  0x72   : > { %679 = vmax.xlane.f32.xlu0 %v678_v61  ;;  %v1940_v61 = vld [vmem:[%s1703_s14 + $0xa0] sm:$0xff]  ;;  %2538 = vst [vmem:[#allocation21_spill] sm:$0xff] %v1943_v62 }
  0x78   : > { %694 = vmax.xlane.f32.xlu2 %v693_v17  ;;  %v211_v17 = vlaneseq }
  0x79   : > { %700 = vmax.xlane.f32.xlu1 %v699_v25  ;;  %v705_v25 = vmax.f32 %v1940_v61, %v1943_v62 }
  0x7a   : > { %688 = vmax.xlane.f32.xlu0 %v687_v24  ;;  %v717_v24 = vmax.f32 %v1934_v53, %v1937_v60  ;;  %v524_v60 = vld [vmem:[%s1954_s8 + $0x20] sm:$0xff] }
  0x7b   : > { %v917_v53 = vld [vmem:[%s1964_s16] sm:$0xff] }
  0x80   : > { %703 = vmax.xlane.f32.xlu2 %v702_v44  ;;  %v1949_v44 = vshrl.u32 %v211_v17, 7 }
  0x81   : > { %709 = vmax.xlane.f32.xlu1 %v708_v52  ;;  %v522_v52 = vld [vmem:[%s1954_s8] sm:$0xff] }
  0x82   : > { %697 = vmax.xlane.f32.xlu0 %v696_v51  ;;  %v1951_v51 = vand.u32 127, %v211_v17  ;;  %v213_v36 = vadd.s32 8, %v1949_v44  ;;  %v918_v17 = vld [vmem:[%s1964_s16 + $0x10] sm:$0xff] }
  0x84   : > { %vm230_vm0 = vcmp.eq.s32.totalorder %v1949_v44, %v1951_v51  ;;  %vm231_vm1 = vcmp.eq.s32.totalorder %v213_v36, %v1951_v51 }
  0x85   : > { %v538_v37 = vsel %vm230_vm0, %v522_v52, 0.0  ;;  %v214_v52 = vadd.s32 16, %v1949_v44  ;;  %v933_v38 = vsel %vm230_vm0, %v917_v53, 0.0 }
  0x87   : > { %vm232_vm2 = vcmp.eq.s32.totalorder %v214_v52, %v1951_v51 }
  0x89   : > { %718 = vmax.xlane.f32.xlu1 %v717_v24  ;;  %v934_v24 = vsel %vm231_vm1, %v918_v17, 0.0 }
  0x8a   : > { %706 = vmax.xlane.f32.xlu0 %v705_v25  ;;  %v1971_v25 = vld [vmem:[%s1703_s14 + $0xc0] sm:$0xff] }
  0x8b   : > { %2539 = vst [vmem:[#allocation22_spill] sm:$0xff] %v1971_v25  ;;  %v711_v49 = vmax.f32 %v1971_v25, %v1974_v50  ;;  %v523_v50 = vld [vmem:[%s1954_s8 + $0x10] sm:$0xff] }
  0x8d   : > { %712 = vmax.xlane.f32.xlu2 %v711_v49 }
  0x91   : > { %554 = vadd.xlane.f32.xlu1 %v538_v37  ;;  %v1980_v37 = vld [vmem:[%s1703_s14 + $0xd0] sm:$0xff] }
  0x92   : > { %2541 = vst [vmem:[#allocation24_spill] sm:$0xff] %v1980_v37  ;;  %v714_v17 = vmax.f32 %v1980_v37, %v1983_v39  ;;  %v720_v39 = vmax.f32 %v1996_v28, %v1999_v27  ;;  %v539_v28 = vsel %vm231_vm1, %v523_v50, 0.0 }
  0x94   : > { %715 = vmax.xlane.f32.xlu0 %v714_v17 }
  0x95   : > { %721 = vmax.xlane.f32.xlu2 %v720_v39 }
  0x99   : > { %951 = vadd.xlane.f32.xlu1 %v934_v24  ;;  %v540_v24 = vsel %vm232_vm2, %v524_v60, 0.0 }
  0x9c   : > { %949 = vadd.xlane.f32.xlu0 %v933_v38 }
  0x9d   : > { %556 = vadd.xlane.f32.xlu2 %v539_v28 }
  0xa1   : > { %558 = vadd.xlane.f32.xlu1 %v540_v24 }
  0xb3   : > { %v2003_v49 = vpop.xlane.xlu2 %291 }
  0xb4   : > { %v2005_v60 = vpop.xlane.xlu1 %285 }
  0xb5   : > { %2545 = vst [vmem:[#allocation28_spill] sm:$0xff] %v2005_v60  ;;  %v2007_v17 = vpop.xlane.xlu0 %279  ;;  %v330_v53 = vsub.f32 %v1723_v2, %v2005_v60  ;;  %v331_v39 = vsub.f32 %v1728_v4, %v2005_v60 }
  0xb6   : > { %2546 = vst [vmem:[#allocation29_spill] sm:$0xff] %v2007_v17  ;;  %v326_v24 = vsub.f32 %v1731_v5, %v2007_v17  ;;  %v327_v38 = vsub.f32 %v1734_v6, %v2007_v17 }
  0xb7   : > { %v366_v62 = vmul.f32 1.442695, %v330_v53  ;;  %v368_v2 = vmul.f32 1.442695, %v331_v39 }
  0xb8   : > { %v358_v37 = vmul.f32 1.442695, %v326_v24  ;;  %v360_v27 = vmul.f32 1.442695, %v327_v38 }
  0xba   : > { %1236 = vpow2.f32 %v358_v37 }
  0xbb   : > { %v2020_v25 = vpop.xlane.xlu2 %294  ;;  %1238 = vpow2.f32 %v360_v27  ;;  %v919_v27 = vld [vmem:[%s1964_s16 + $0x20] sm:$0xff] }
  0xbc   : > { %v2022_v5 = vpop.xlane.xlu1 %288  ;;  %1240 = vpow2.f32 %v366_v62 }
  0xbd   : > { %v2024_v6 = vpop.xlane.xlu0 %282  ;;  %1242 = vpow2.f32 %v368_v2 }
  0xbe   : > { %2547 = vst [vmem:[#allocation30_spill] sm:$0xff] %v2024_v6  ;;  %v328_v24 = vsub.f32 %v1753_v13, %v2024_v6  ;;  %v329_v4 = vsub.f32 %v1756_v14, %v2024_v6  ;;  %v935_v14 = vsel %vm232_vm2, %v919_v27, 0.0 }
  0xbf   : > { %953 = vadd.xlane.f32.xlu2 %v935_v14 }
  0xc0   : > { %v362_v36 = vmul.f32 1.442695, %v328_v24  ;;  %v364_v28 = vmul.f32 1.442695, %v329_v4  ;;  %v1237_v50 = vpop.eup %1236 }
  0xc1   : > { %v1239_v38 = vpop.eup %1238 }
  0xc2   : > { %1244 = vpow2.f32 %v362_v36  ;;  %v422_v53 = vadd.f32 %v1239_v38, %v1237_v50  ;;  %v1241_v13 = vpop.eup %1240 }
  0xc3   : > { %v2030_v37 = vpop.xlane.xlu2 %303  ;;  %1246 = vpow2.f32 %v364_v28  ;;  %v1243_v62 = vpop.eup %1242 }
  0xc4   : > { %v2032_v60 = vpop.xlane.xlu1 %300  ;;  %423 = vadd.xlane.f32.xlu1 %v422_v53  ;;  %v428_v24 = vadd.f32 %v1243_v62, %v1241_v13 }
  0xc5   : > { %v2034_v39 = vpop.xlane.xlu0 %297 }
  0xc8   : > { %v1245_v2 = vpop.eup %1244 }
  0xc9   : > { %v1247_v4 = vpop.eup %1246 }
  0xca   : > { %v425_v36 = vadd.f32 %v1247_v4, %v1245_v2 }
  0xcb   : > { %v2039_v6 = vpop.xlane.xlu2 %312 }
  0xcc   : > { %2548 = vst [vmem:[#allocation31_spill] sm:$0xff] %v2039_v6  ;;  %v2041_v50 = vpop.xlane.xlu1 %309  ;;  %429 = vadd.xlane.f32.xlu1 %v428_v24  ;;  %426 = vadd.xlane.f32.xlu0 %v425_v36  ;;  %v334_v24 = vsub.f32 %v1717_v0, %v2003_v49 }
  0xcd   : > { %v2043_v38 = vpop.xlane.xlu0 %306 }
  0xce   : > { %v374_v0 = vmul.f32 1.442695, %v334_v24 }
  0xd3   : > { %v2045_v28 = vpop.xlane.xlu2 %321 }
  0xd4   : > { %2549 = vst [vmem:[#allocation32_spill] sm:$0xff] %v2045_v28  ;;  %v2047_v53 = vpop.xlane.xlu1 %318  ;;  %v332_v28 = vsub.f32 %v1747_v11, %v2022_v5 }
  0xd5   : > { %2550 = vst [vmem:[#allocation33_spill] sm:$0xff] %v2047_v53  ;;  %v2049_v52 = vpop.xlane.xlu0 %315 }
  0xdb   : > { %v2051_v27 = vpop.xlane.xlu2 %676 }
  0xdc   : > { %2551 = vst [vmem:[#allocation34_spill] sm:$0xff] %v2051_v27  ;;  %v723_v13 = vsub.f32 %v1837_v45, %v2051_v27  ;;  %v724_v14 = vsub.f32 %v1840_v46, %v2051_v27  ;;  %v2057_v62 = vpop.xlane.xlu1 %682  ;;  %v333_v46 = vsub.f32 %v1750_v12, %v2022_v5 }
  0xdd   : > { %v2059_v2 = vpop.xlane.xlu0 %324  ;;  %v727_v4 = vsub.f32 %v1843_v47, %v2057_v62  ;;  %v728_v36 = vsub.f32 %v1846_v48, %v2057_v62  ;;  %v370_v47 = vmul.f32 1.442695, %v332_v28 }
  0xde   : > { %2552 = vst [vmem:[#allocation35_spill] sm:$0xff] %v2059_v2  ;;  %v755_v45 = vmul.f32 1.442695, %v723_v13  ;;  %v757_v17 = vmul.f32 1.442695, %v724_v14  ;;  %v335_v2 = vsub.f32 %v1720_v1, %v2003_v49 }
  0xdf   : > { %v763_v27 = vmul.f32 1.442695, %v727_v4  ;;  %v765_v53 = vmul.f32 1.442695, %v728_v36  ;;  %v372_v6 = vmul.f32 1.442695, %v333_v46 }
  0xe0   : > { %1248 = vpow2.f32 %v755_v45  ;;  %v376_v11 = vmul.f32 1.442695, %v335_v2 }
  0xe1   : > { %1250 = vpow2.f32 %v757_v17 }
  0xe2   : > { %1252 = vpow2.f32 %v763_v27 }
  0xe3   : > { %1254 = vpow2.f32 %v765_v53  ;;  %v2073_v48 = vpop.xlane.xlu2 %685 }
  0xe4   : > { %v729_v12 = vsub.f32 %v1864_v55, %v2073_v48  ;;  %v2079_v14 = vpop.xlane.xlu1 %691  ;;  %1256 = vpow2.f32 %v374_v0  ;;  %v730_v28 = vsub.f32 %v1867_v56, %v2073_v48  ;;  %v336_v56 = vsub.f32 %v1741_v9, %v2020_v25 }
  0xe5   : > { %v2075_v13 = vpop.xlane.xlu0 %679  ;;  %1258 = vpow2.f32 %v370_v47  ;;  %v733_v27 = vsub.f32 %v1873_v58, %v2079_v14  ;;  %v734_v4 = vsub.f32 %v1876_v59, %v2079_v14  ;;  %v337_v59 = vsub.f32 %v1744_v10, %v2020_v25 }
  0xe6   : > { %v725_v1 = vsub.f32 %v1861_v54, %v2075_v13  ;;  %v726_v17 = vsub.f32 %v1870_v57, %v2075_v13  ;;  %v1249_v53 = vpop.eup %1248  ;;  %1260 = vpow2.f32 %v372_v6  ;;  %v767_v45 = vmul.f32 1.442695, %v729_v12 }
  0xe7   : > { %v1251_v2 = vpop.eup %1250  ;;  %1262 = vpow2.f32 %v376_v11  ;;  %v769_v46 = vmul.f32 1.442695, %v730_v28  ;;  %v775_v0 = vmul.f32 1.442695, %v733_v27  ;;  %v777_v47 = vmul.f32 1.442695, %v734_v4 }
  0xe8   : > { %v759_v55 = vmul.f32 1.442695, %v725_v1  ;;  %v761_v24 = vmul.f32 1.442695, %v726_v17  ;;  %v1253_v36 = vpop.eup %1252  ;;  %v819_v54 = vadd.f32 %v1251_v2, %v1249_v53  ;;  %v338_v9 = vsub.f32 %v1777_v22, %v2034_v39 }
  0xe9   : > { %v1255_v57 = vpop.eup %1254  ;;  %v378_v2 = vmul.f32 1.442695, %v336_v56 }
  0xea   : > { %1264 = vpow2.f32 %v759_v55  ;;  %820 = vadd.xlane.f32.xlu2 %v819_v54  ;;  %v825_v58 = vadd.f32 %v1255_v57, %v1253_v36  ;;  %v1257_v6 = vpop.eup %1256  ;;  %v380_v54 = vmul.f32 1.442695, %v337_v59 }
  0xeb   : > { %1266 = vpow2.f32 %v761_v24  ;;  %v1259_v1 = vpop.eup %1258 }
  0xec   : > { %826 = vadd.xlane.f32.xlu1 %v825_v58  ;;  %1268 = vpow2.f32 %v767_v45  ;;  %v2097_v12 = vpop.xlane.xlu1 %700  ;;  %v1261_v17 = vpop.eup %1260 }
  0xed   : > { %v2095_v11 = vpop.xlane.xlu0 %688  ;;  %1270 = vpow2.f32 %v769_v46  ;;  %v1263_v27 = vpop.eup %1262  ;;  %v739_v10 = vsub.f32 %v1897_v15, %v2097_v12  ;;  %v740_v22 = vsub.f32 %v1900_v16, %v2097_v12  ;;  %v431_v45 = vadd.f32 %v1261_v17, %v1259_v1 }
  0xee   : > { %v731_v28 = vsub.f32 %v1885_v63, %v2095_v11  ;;  %v732_v53 = vsub.f32 %v1894_v8, %v2095_v11  ;;  %1272 = vpow2.f32 %v775_v0  ;;  %v339_v63 = vsub.f32 %v1780_v23, %v2034_v39  ;;  %v2111_v58 = vpop.xlane.xlu2 %694 }
  0xef   : > { %1274 = vpow2.f32 %v777_v47  ;;  %v382_v8 = vmul.f32 1.442695, %v338_v9  ;;  %v434_v15 = vadd.f32 %v1263_v27, %v1257_v6  ;;  %v787_v56 = vmul.f32 1.442695, %v739_v10 }
  0xf0   : > { %v1265_v55 = vpop.eup %1264  ;;  %v771_v24 = vmul.f32 1.442695, %v731_v28  ;;  %v773_v4 = vmul.f32 1.442695, %v732_v53  ;;  %v789_v16 = vmul.f32 1.442695, %v740_v22  ;;  %v340_v23 = vsub.f32 %v1771_v20, %v2032_v60 }
  0xf1   : > { %v1267_v36 = vpop.eup %1266  ;;  %v384_v1 = vmul.f32 1.442695, %v339_v63  ;;  %v735_v17 = vsub.f32 %v1888_v3, %v2111_v58  ;;  %v736_v6 = vsub.f32 %v1891_v7, %v2111_v58  ;;  %v341_v28 = vsub.f32 %v1774_v21, %v2032_v60 }
  0xf2   : > { %1276 = vpow2.f32 %v771_v24  ;;  %v822_v57 = vadd.f32 %v1267_v36, %v1265_v55  ;;  %v1269_v46 = vpop.eup %1268  ;;  %432 = vadd.xlane.f32.xlu2 %v431_v45  ;;  %v344_v20 = vsub.f32 %v1801_v31, %v2043_v38  ;;  %v345_v3 = vsub.f32 %v1804_v32, %v2043_v38 }
  0xf3   : > { %1278 = vpow2.f32 %v773_v4  ;;  %v1271_v0 = vpop.eup %1270  ;;  %v779_v4 = vmul.f32 1.442695, %v735_v17  ;;  %v781_v22 = vmul.f32 1.442695, %v736_v6 }
  0xf4   : > { %1280 = vpow2.f32 %v378_v2  ;;  %823 = vadd.xlane.f32.xlu0 %v822_v57  ;;  %v1273_v47 = vpop.eup %1272  ;;  %435 = vadd.xlane.f32.xlu1 %v434_v15  ;;  %v828_v53 = vadd.f32 %v1271_v0, %v1269_v46  ;;  %v386_v2 = vmul.f32 1.442695, %v340_v23  ;;  %v394_v45 = vmul.f32 1.442695, %v344_v20 }
  0xf5   : > { %1282 = vpow2.f32 %v380_v54  ;;  %v1275_v59 = vpop.eup %1274  ;;  %v2125_v36 = vpop.xlane.xlu0 %697  ;;  %v388_v54 = vmul.f32 1.442695, %v341_v28  ;;  %v343_v20 = vsub.f32 %v1768_v19, %v2030_v37  ;;  %v346_v19 = vsub.f32 %v1795_v29, %v2041_v50 }
  0xf6   : > { %1284 = vpow2.f32 %v382_v8  ;;  %v834_v10 = vadd.f32 %v1275_v59, %v1273_v47  ;;  %v396_v8 = vmul.f32 1.442695, %v345_v3  ;;  %v737_v32 = vsub.f32 %v1909_v26, %v2125_v36 }
  0xf7   : > { %1286 = vpow2.f32 %v787_v56  ;;  %v738_v46 = vsub.f32 %v1918_v35, %v2125_v36  ;;  %v347_v29 = vsub.f32 %v1798_v30, %v2041_v50 }
  0xf8   : > { %v1277_v9 = vpop.eup %1276  ;;  %1288 = vpow2.f32 %v789_v16  ;;  %v783_v16 = vmul.f32 1.442695, %v737_v32  ;;  %v398_v32 = vmul.f32 1.442695, %v346_v19 }
  0xf9   : > { %v1279_v27 = vpop.eup %1278  ;;  %1290 = vpow2.f32 %v384_v1  ;;  %v785_v23 = vmul.f32 1.442695, %v738_v46  ;;  %v2131_v1 = vpop.xlane.xlu2 %703 }
  0xfa   : > { %v1281_v55 = vpop.eup %1280  ;;  %v831_v24 = vadd.f32 %v1279_v27, %v1277_v9  ;;  %1292 = vpow2.f32 %v386_v2  ;;  %v741_v35 = vsub.f32 %v1912_v33, %v2131_v1  ;;  %v742_v9 = vsub.f32 %v1915_v34, %v2131_v1  ;;  %v2139_v2 = vpop.xlane.xlu1 %709 }
  0xfb   : > { %v1283_v7 = vpop.eup %1282  ;;  %1294 = vpow2.f32 %v779_v4  ;;  %v2144_v33 = vadd.s32 24, %v1949_v44  ;;  %v2147_v34 = vadd.s32 32, %v1949_v44 }
  0xfc   : > { %v1285_v21 = vpop.eup %1284  ;;  %829 = vadd.xlane.f32.xlu0 %v828_v53  ;;  %832 = vadd.xlane.f32.xlu2 %v831_v24  ;;  %1296 = vpow2.f32 %v781_v22  ;;  %v437_v56 = vadd.f32 %v1283_v7, %v1281_v55  ;;  %v342_v53 = vsub.f32 %v1765_v18, %v2030_v37  ;;  %v791_v55 = vmul.f32 1.442695, %v741_v35 }
  0xfd   : > { %v1287_v63 = vpop.eup %1286  ;;  %835 = vadd.xlane.f32.xlu1 %v834_v10  ;;  %1298 = vpow2.f32 %v388_v54  ;;  %v793_v24 = vmul.f32 1.442695, %v742_v9  ;;  %v392_v22 = vmul.f32 1.442695, %v343_v20  ;;  %vm233_vm3 = vcmp.eq.s32.totalorder %v2144_v33, %v1951_v51  ;;  %v2180_v9 = vpop.xlane.xlu0 %706  ;;  %v2555_v33 = vld [vmem:[#allocation23_spill] sm:$0xff] }
  0xfe   : > { %v1289_v31 = vpop.eup %1288  ;;  %1300 = vpow2.f32 %v394_v45  ;;  %v390_v18 = vmul.f32 1.442695, %v342_v53  ;;  %v745_v54 = vsub.f32 %v1921_v42, %v2139_v2  ;;  %vm234_vm4 = vcmp.eq.s32.totalorder %v2147_v34, %v1951_v51  ;;  %v2559_v34 = vld [vmem:[#allocation33_spill] sm:$0xff] }
  0xff   : > { %v1291_v57 = vpop.eup %1290  ;;  %v843_v15 = vadd.f32 %v1289_v31, %v1287_v63  ;;  %1302 = vpow2.f32 %v396_v8  ;;  %v921_v63 = vld [vmem:[%s1964_s16 + $0x40] sm:$0xff]  ;;  %v746_v45 = vsub.f32 %v1924_v43, %v2139_v2  ;;  %v217_v43 = vadd.s32 40, %v1949_v44 }
 0x100   : > { %v440_v0 = vadd.f32 %v1291_v57, %v1285_v21  ;;  %v1293_v47 = vpop.eup %1292  ;;  %1304 = vpow2.f32 %v783_v16  ;;  %v525_v21 = vld [vmem:[%s1954_s8 + $0x30] sm:$0xff]  ;;  %v937_v42 = vsel %vm234_vm4, %v921_v63, 0.0  ;;  %v799_v46 = vmul.f32 1.442695, %v745_v54 }
 0x101   : > { %v1295_v59 = vpop.eup %1294  ;;  %1306 = vpow2.f32 %v785_v23  ;;  %v541_v8 = vsel %vm233_vm3, %v525_v21, 0.0  ;;  %vm235_vm5 = vcmp.eq.s32.totalorder %v217_v43, %v1951_v51  ;;  %v527_v23 = vld [vmem:[%s1954_s8 + $0x50] sm:$0xff]  ;;  %v2192_v54 = vpop.xlane.xlu2 %712 }
 0x102   : > { %v1297_v26 = vpop.eup %1296  ;;  %1308 = vpow2.f32 %v791_v55  ;;  %v2169_v57 = vpop.xlane.xlu1 %718  ;;  %v543_v35 = vsel %vm235_vm5, %v527_v23, 0.0  ;;  %v922_v63 = vld [vmem:[%s1964_s16 + $0x50] sm:$0xff] }
 0x103   : > { %v1299_v17 = vpop.eup %1298  ;;  %v837_v27 = vadd.f32 %v1297_v26, %v1295_v59  ;;  %1310 = vpow2.f32 %v793_v24  ;;  %v350_v26 = vsub.f32 %v1825_v40, %v2049_v52  ;;  %v920_v40 = vld [vmem:[%s1964_s16 + $0x30] sm:$0xff]  ;;  %v2553_v24 = vld [vmem:[#allocation21_spill] sm:$0xff] }
 0x104   : > { %438 = vadd.xlane.f32.xlu0 %v437_v56  ;;  %441 = vadd.xlane.f32.xlu2 %v440_v0  ;;  %v1301_v6 = vpop.eup %1300  ;;  %v443_v10 = vadd.f32 %v1299_v17, %v1293_v47  ;;  %1312 = vpow2.f32 %v390_v18  ;;  %v801_v56 = vmul.f32 1.442695, %v746_v45  ;;  %v400_v0 = vmul.f32 1.442695, %v347_v29  ;;  %v526_v45 = vld [vmem:[%s1954_s8 + $0x40] sm:$0xff] }
 0x105   : > { %844 = vadd.xlane.f32.xlu1 %v843_v15  ;;  %v1303_v28 = vpop.eup %1302  ;;  %1314 = vpow2.f32 %v392_v22  ;;  %v351_v17 = vsub.f32 %v1828_v41, %v2049_v52  ;;  %v406_v20 = vmul.f32 1.442695, %v350_v26  ;;  %v743_v41 = vsub.f32 %v1940_v61, %v2180_v9 }
 0x106   : > { %v449_v3 = vadd.f32 %v1303_v28, %v1301_v6  ;;  %v1305_v4 = vpop.eup %1304  ;;  %1316 = vpow2.f32 %v398_v32  ;;  %v748_v32 = vsub.f32 %v2555_v33, %v2192_v54 }
 0x107   : > { %v1307_v7 = vpop.eup %1306  ;;  %1318 = vpow2.f32 %v799_v46  ;;  %v408_v55 = vmul.f32 1.442695, %v351_v17  ;;  %v795_v19 = vmul.f32 1.442695, %v743_v41  ;;  %v2556_v46 = vld [vmem:[#allocation31_spill] sm:$0xff] }
 0x108   : > { %v840_v31 = vadd.f32 %v1307_v7, %v1305_v4  ;;  %v1309_v15 = vpop.eup %1308  ;;  %1320 = vpow2.f32 %v801_v56  ;;  %v744_v4 = vsub.f32 %v2553_v24, %v2180_v9  ;;  %v936_v7 = vsel %vm233_vm3, %v920_v40, 0.0  ;;  %v528_v40 = vld [vmem:[%s1954_s8 + $0x60] sm:$0xff]  ;;  %v2561_v41 = vld [vmem:[#allocation19_spill] sm:$0xff] }
 0x109   : > { %v1311_v30 = vpop.eup %1310  ;;  %1322 = vpow2.f32 %v400_v0  ;;  %v805_v17 = vmul.f32 1.442695, %v748_v32  ;;  %v924_v24 = vld [vmem:[%s1964_s16 + $0x70] sm:$0xff] }
 0x10a   : > { %v1313_v16 = vpop.eup %1312  ;;  %v846_v59 = vadd.f32 %v1311_v30, %v1309_v15  ;;  %v2182_v53 = vpop.xlane.xlu1 %554  ;;  %1324 = vpow2.f32 %v406_v20  ;;  %v797_v21 = vmul.f32 1.442695, %v744_v4  ;;  %v2557_v15 = vld [vmem:[#allocation11_spill] sm:$0xff]  ;;  %v2558_v30 = vld [vmem:[#allocation12_spill] sm:$0xff] }
 0x10b   : > { %v1315_v47 = vpop.eup %1314  ;;  %1326 = vpow2.f32 %v408_v55  ;;  %v348_v56 = vsub.f32 %v2557_v15, %v2556_v46  ;;  %v349_v0 = vsub.f32 %v2558_v30, %v2556_v46  ;;  %v2560_v20 = vld [vmem:[#allocation15_spill] sm:$0xff]  ;;  %v2219_v55 = vpop.xlane.xlu0 %715  ;;  %v2562_v4 = vld [vmem:[#allocation20_spill] sm:$0xff] }
 0x10c   : > { %838 = vadd.xlane.f32.xlu0 %v837_v27  ;;  %444 = vadd.xlane.f32.xlu2 %v443_v10  ;;  %v446_v6 = vadd.f32 %v1315_v47, %v1313_v16  ;;  %v1317_v28 = vpop.eup %1316  ;;  %1328 = vpow2.f32 %v795_v19  ;;  %v938_v16 = vsel %vm235_vm5, %v922_v63, 0.0  ;;  %v542_v47 = vsel %vm234_vm4, %v526_v45, 0.0  ;;  %v2563_v19 = vld [vmem:[#allocation16_spill] sm:$0xff] }
 0x10d   : > { %450 = vadd.xlane.f32.xlu1 %v449_v3  ;;  %v1319_v27 = vpop.eup %1318  ;;  %1330 = vpow2.f32 %v797_v21  ;;  %v353_v21 = vsub.f32 %v2563_v19, %v2559_v34 }
 0x10e   : > { %v1321_v10 = vpop.eup %1320 }
 0x10f   : > { %v1323_v3 = vpop.eup %1322  ;;  %v852_v18 = vadd.f32 %v1321_v10, %v1319_v27  ;;  %v404_v27 = vmul.f32 1.442695, %v349_v0  ;;  %v352_v10 = vsub.f32 %v2560_v20, %v2559_v34  ;;  %v412_v15 = vmul.f32 1.442695, %v353_v21  ;;  %v530_v0 = vld [vmem:[%s1954_s8 + $0x80] sm:$0xff] }
 0x110   : > { %v452_v22 = vadd.f32 %v1323_v3, %v1317_v28  ;;  %v402_v28 = vmul.f32 1.442695, %v348_v56  ;;  %v751_v3 = vsub.f32 %v2561_v41, %v2169_v57  ;;  %v2568_v21 = vld [vmem:[#allocation25_spill] sm:$0xff] }
 0x111   : > { %v410_v45 = vmul.f32 1.442695, %v352_v10 }
 0x112   : > { %v2194_v61 = vpop.xlane.xlu1 %951 }
 0x114   : > { %560 = vadd.xlane.f32.xlu2 %v541_v8  ;;  %841 = vadd.xlane.f32.xlu0 %v840_v31  ;;  %v2554_v31 = vld [vmem:[#allocation22_spill] sm:$0xff]  ;;  %v1325_v8 = vpop.eup %1324 }
 0x115   : > { %957 = vadd.xlane.f32.xlu1 %v937_v42  ;;  %v747_v29 = vsub.f32 %v2554_v31, %v2192_v54  ;;  %v1327_v42 = vpop.eup %1326 }
 0x116   : > { %v458_v26 = vadd.f32 %v1327_v42, %v1325_v8  ;;  %v2242_v8 = vadd.s32 64, %v1949_v44 }
 0x117   : > { %v803_v23 = vmul.f32 1.442695, %v747_v29  ;;  %v811_v29 = vmul.f32 1.442695, %v751_v3 }
 0x118   : > { %vm238_vm8 = vcmp.eq.s32.totalorder %v2242_v8, %v1951_v51 }
 0x119   : > { %1332 = vpow2.f32 %v803_v23  ;;  %v2564_v23 = vld [vmem:[#allocation35_spill] sm:$0xff] }
 0x11a   : > { %1334 = vpow2.f32 %v805_v17 }
 0x11b   : > { %1336 = vpow2.f32 %v402_v28 }
 0x11c   : > { %847 = vadd.xlane.f32.xlu2 %v846_v59  ;;  %447 = vadd.xlane.f32.xlu0 %v446_v6  ;;  %v2212_v59 = vadd.s32 48, %v1949_v44  ;;  %v1329_v6 = vpop.eup %1328  ;;  %1338 = vpow2.f32 %v404_v27  ;;  %v546_v27 = vsel %vm238_vm8, %v530_v0, 0.0 }
 0x11d   : > { %564 = vadd.xlane.f32.xlu1 %v543_v35  ;;  %v2215_v35 = vadd.s32 56, %v1949_v44  ;;  %v1331_v43 = vpop.eup %1330  ;;  %1340 = vpow2.f32 %v410_v45 }
 0x11e   : > { %vm236_vm6 = vcmp.eq.s32.totalorder %v2212_v59, %v1951_v51  ;;  %1342 = vpow2.f32 %v811_v29 }
 0x11f   : > { %vm237_vm7 = vcmp.eq.s32.totalorder %v2215_v35, %v1951_v51  ;;  %v544_v63 = vsel %vm236_vm6, %v528_v40, 0.0  ;;  %v1333_v33 = vpop.eup %1332 }
 0x120   : > { %v940_v31 = vsel %vm237_vm7, %v924_v24, 0.0  ;;  %v1335_v42 = vpop.eup %1334 }
 0x121   : > { %v1337_v56 = vpop.eup %1336 }
 0x122   : > { %v1339_v30 = vpop.eup %1338 }
 0x123   : > { %v455_v20 = vadd.f32 %v1339_v30, %v1337_v56  ;;  %v1341_v10 = vpop.eup %1340 }
 0x124   : > { %453 = vadd.xlane.f32.xlu2 %v452_v22  ;;  %955 = vadd.xlane.f32.xlu0 %v936_v7  ;;  %v2231_v7 = vpop.xlane.xlu1 %558  ;;  %v849_v22 = vadd.f32 %v1331_v43, %v1329_v6  ;;  %v2566_v6 = vld [vmem:[#allocation18_spill] sm:$0xff]  ;;  %v1343_v40 = vpop.eup %1342 }
 0x125   : > { %853 = vadd.xlane.f32.xlu1 %v852_v18  ;;  %v752_v18 = vsub.f32 %v2562_v4, %v2169_v57  ;;  %v357_v28 = vsub.f32 %v2566_v6, %v2564_v23  ;;  %v2567_v4 = vld [vmem:[#allocation24_spill] sm:$0xff] }
 0x127   : > { %v813_v32 = vmul.f32 1.442695, %v752_v18  ;;  %v420_v24 = vmul.f32 1.442695, %v357_v28  ;;  %v749_v18 = vsub.f32 %v2567_v4, %v2219_v55  ;;  %v925_v28 = vld [vmem:[%s1964_s16 + $0x80] sm:$0xff] }
 0x129   : > { %1344 = vpow2.f32 %v813_v32  ;;  %v807_v32 = vmul.f32 1.442695, %v749_v18  ;;  %v2574_v18 = vld [vmem:[#allocation14_spill] sm:$0xff] }
 0x12a   : > { %1346 = vpow2.f32 %v412_v15 }
 0x12c   : > { %959 = vadd.xlane.f32.xlu2 %v938_v16  ;;  %562 = vadd.xlane.f32.xlu0 %v542_v47  ;;  %v2247_v16 = vpop.xlane.xlu0 %949  ;;  %v855_v47 = vadd.f32 %v1335_v42, %v1333_v33 }
 0x12d   : > { %459 = vadd.xlane.f32.xlu1 %v458_v26  ;;  %v2565_v26 = vld [vmem:[#allocation17_spill] sm:$0xff] }
 0x12e   : > { %v356_v17 = vsub.f32 %v2565_v26, %v2564_v23 }
 0x12f   : > { %v1345_v3 = vpop.eup %1344 }
 0x130   : > { %v418_v41 = vmul.f32 1.442695, %v356_v17  ;;  %v1347_v19 = vpop.eup %1346  ;;  %v861_v29 = vadd.f32 %v1345_v3, %v1343_v40  ;;  %v2570_v17 = vld [vmem:[#allocation26_spill] sm:$0xff]  ;;  %v2573_v3 = vld [vmem:[#allocation13_spill] sm:$0xff] }
 0x131   : > { %v461_v30 = vadd.f32 %v1347_v19, %v1341_v10 }
 0x134   : > { %566 = vadd.xlane.f32.xlu2 %v544_v63  ;;  %850 = vadd.xlane.f32.xlu0 %v849_v22  ;;  %v923_v22 = vld [vmem:[%s1964_s16 + $0x60] sm:$0xff]  ;;  %v750_v63 = vsub.f32 %v2568_v21, %v2219_v55 }
 0x135   : > { %963 = vadd.xlane.f32.xlu1 %v940_v31  ;;  %v2261_v31 = vpop.xlane.xlu2 %721  ;;  %v939_v33 = vsel %vm236_vm6, %v923_v22, 0.0 }
 0x136   : > { %v809_v0 = vmul.f32 1.442695, %v750_v63  ;;  %v753_v6 = vsub.f32 %v2570_v17, %v2261_v31  ;;  %v2576_v17 = vld [vmem:[#allocation30_spill] sm:$0xff] }
 0x137   : > { %v424_v43 = vpop.xlane.xlu1 %423 }
 0x138   : > { %1348 = vlog2.f32 %v424_v43  ;;  %v529_v43 = vld [vmem:[%s1954_s8 + $0x70] sm:$0xff] }
 0x139   : > { %1350 = vpow2.f32 %v418_v41  ;;  %v2572_v41 = vld [vmem:[#allocation32_spill] sm:$0xff]  ;;  %v545_v19 = vsel %vm237_vm7, %v529_v43, 0.0  ;;  %v531_v43 = vld [vmem:[%s1954_s8 + $0x90] sm:$0xff] }
 0x13a   : > { %1352 = vpow2.f32 %v420_v24  ;;  %v354_v24 = vsub.f32 %v2573_v3, %v2572_v41  ;;  %v355_v22 = vsub.f32 %v2574_v18, %v2572_v41  ;;  %v224_v18 = vadd.s32 96, %v1949_v44 }
 0x13c   : > { %856 = vadd.xlane.f32.xlu2 %v855_v47  ;;  %456 = vadd.xlane.f32.xlu0 %v455_v20  ;;  %v2569_v47 = vld [vmem:[#allocation29_spill] sm:$0xff]  ;;  %v2571_v20 = vld [vmem:[#allocation27_spill] sm:$0xff]  ;;  %v414_v8 = vmul.f32 1.442695, %v354_v24  ;;  %vm242_vm12 = vcmp.eq.s32.totalorder %v224_v18, %v1951_v51 }
 0x13d   : > { %570 = vadd.xlane.f32.xlu1 %v546_v27  ;;  %v754_v10 = vsub.f32 %v2571_v20, %v2261_v31  ;;  %v557_v35 = vpop.xlane.xlu2 %556  ;;  %v927_v20 = vld [vmem:[%s1964_s16 + $0xa0] sm:$0xff] }
 0x13e   : > { %v1349_v45 = vpop.eup %1348 }
 0x13f   : > { %v471_v42 = vmul.f32 0.6931472, %v1349_v45  ;;  %v430_v15 = vpop.xlane.xlu1 %429  ;;  %v427_v56 = vpop.xlane.xlu0 %426  ;;  %v815_v45 = vmul.f32 1.442695, %v753_v6 }
 0x140   : > { %1354 = vlog2.f32 %v430_v15  ;;  %v1351_v27 = vpop.eup %1350  ;;  %v2288_v15 = vadd.s32 80, %v1949_v44 }
 0x141   : > { %v502_v26 = vadd.f32 %v471_v42, %v2569_v47  ;;  %1356 = vlog2.f32 %v427_v56  ;;  %v1353_v40 = vpop.eup %1352 }
 0x142   : > { %1358 = vpow2.f32 %v807_v32  ;;  %v817_v32 = vmul.f32 1.442695, %v754_v10  ;;  %v467_v42 = vadd.f32 %v1353_v40, %v1351_v27  ;;  %vm240_vm11 = vcmp.eq.s32.totalorder %v2288_v15, %v1951_v51  ;;  %v536_v15 = vld [vmem:[%s1954_s8 + $0xe0] sm:$0xff] }
 0x143   : > { %v586_v59 = vsub.f32 %v502_v26, %v2182_v53  ;;  %1360 = vpow2.f32 %v809_v0  ;;  %v941_v53 = vsel %vm238_vm8, %v925_v28, 0.0  ;;  %v416_v26 = vmul.f32 1.442695, %v355_v22 }
 0x144   : > { %462 = vadd.xlane.f32.xlu2 %v461_v30  ;;  %961 = vadd.xlane.f32.xlu0 %v939_v33  ;;  %v2575_v30 = vld [vmem:[#allocation28_spill] sm:$0xff]  ;;  %1362 = vpow2.f32 %v815_v45 }
 0x145   : > { %862 = vadd.xlane.f32.xlu1 %v861_v29  ;;  %v2285_v29 = vadd.s32 72, %v1949_v44  ;;  %1364 = vpow2.f32 %v817_v32  ;;  %v603_v40 = vsel %vm602_vm9, %v586_v59, 0.0  ;;  %v2309_v59 = vpop.xlane.xlu2 %953 }
 0x146   : > { %v1355_v4 = vpop.eup %1354  ;;  %1366 = vpow2.f32 %v414_v8  ;;  %v223_v8 = vadd.s32 88, %v1949_v44 }
 0x147   : > { %v1357_v21 = vpop.eup %1356  ;;  %v475_v63 = vmul.f32 0.6931472, %v1355_v4  ;;  %vm239_vm10 = vcmp.eq.s32.totalorder %v2285_v29, %v1951_v51  ;;  %1368 = vpow2.f32 %v416_v26  ;;  %v943_v4 = vsel %vm240_vm11, %v927_v20, 0.0  ;;  %v930_v26 = vld [vmem:[%s1964_s16 + $0xd0] sm:$0xff] }
 0x148   : > { %v473_v33 = vmul.f32 0.6931472, %v1357_v21  ;;  %v1359_v56 = vpop.eup %1358  ;;  %vm241_vm13 = vcmp.eq.s32.totalorder %v223_v8, %v1951_v51  ;;  %v537_v29 = vld [vmem:[%s1954_s8 + $0xf0] sm:$0xff] }
 0x149   : > { %v504_v0 = vadd.f32 %v475_v63, %v2575_v30  ;;  %v1361_v47 = vpop.eup %1360  ;;  %v2319_v30 = vadd.s32 104, %v1949_v44 }
 0x14a   : > { %v503_v6 = vadd.f32 %v473_v33, %v2576_v17  ;;  %v858_v10 = vadd.f32 %v1361_v47, %v1359_v56  ;;  %v534_v33 = vld [vmem:[%s1954_s8 + $0xc0] sm:$0xff]  ;;  %v926_v47 = vld [vmem:[%s1964_s16 + $0x90] sm:$0xff] }
 0x14b   : > { %v588_v28 = vsub.f32 %v504_v0, %v2231_v7  ;;  %v547_v7 = vsel %vm239_vm10, %v531_v43, 0.0  ;;  %vm243_vm14 = vcmp.eq.s32.totalorder %v2319_v30, %v1951_v51 }
 0x14c   : > { %965 = vadd.xlane.f32.xlu2 %v941_v53  ;;  %568 = vadd.xlane.f32.xlu0 %v545_v19  ;;  %v587_v27 = vsub.f32 %v503_v6, %v557_v35  ;;  %v1363_v53 = vpop.eup %1362  ;;  %v533_v35 = vld [vmem:[%s1954_s8 + $0xb0] sm:$0xff]  ;;  %v946_v43 = vsel %vm243_vm14, %v930_v26, 0.0 }
 0x14d   : > { %468 = vadd.xlane.f32.xlu1 %v467_v42  ;;  %v606_v22 = vsel %vm602_vm9, %v588_v28, 0.0  ;;  %v1365_v21 = vpop.eup %1364  ;;  %v550_v42 = vsel %vm242_vm12, %v534_v33, 0.0  ;;  %v549_v6 = vsel %vm241_vm13, %v533_v35, 0.0  ;;  %v942_v28 = vsel %vm239_vm10, %v926_v47, 0.0  ;;  %v928_v47 = vld [vmem:[%s1964_s16 + $0xb0] sm:$0xff] }
 0x14e   : > { %v604_v3 = vsel %vm602_vm9, %v587_v27, 0.0  ;;  %v1367_v63 = vpop.eup %1366  ;;  %v864_v32 = vadd.f32 %v1365_v21, %v1363_v53  ;;  %v227_v27 = vadd.s32 120, %v1949_v44 }
 0x14f   : > { %v605_v24 = vadd.f32 %v604_v3, %v603_v40  ;;  %v1369_v45 = vpop.eup %1368  ;;  %v929_v3 = vld [vmem:[%s1964_s16 + $0xc0] sm:$0xff] }
 0x150   : > { %v464_v56 = vadd.f32 %v1369_v45, %v1367_v63  ;;  %vm245_vm15 = vcmp.eq.s32.totalorder %v227_v27, %v1951_v51  ;;  %v945_v45 = vsel %vm242_vm12, %v929_v3, 0.0  ;;  %v535_v3 = vld [vmem:[%s1954_s8 + $0xd0] sm:$0xff] }
 0x151   : > { %v2311_v19 = vadd.f32 %v606_v22, %v605_v24  ;;  %v2577_v22 = vld [vmem:[#allocation34_spill] sm:$0xff] }
 0x154   : > { %572 = vadd.xlane.f32.xlu2 %v547_v7  ;;  %859 = vadd.xlane.f32.xlu0 %v858_v10  ;;  %v532_v7 = vld [vmem:[%s1954_s8 + $0xa0] sm:$0xff] }
 0x155   : > { %969 = vadd.xlane.f32.xlu1 %v943_v4  ;;  %v548_v33 = vsel %vm240_vm11, %v532_v7, 0.0 }
 0x15c   : > { %865 = vadd.xlane.f32.xlu2 %v864_v32  ;;  %465 = vadd.xlane.f32.xlu0 %v464_v56  ;;  %v553_v56 = vsel %vm245_vm15, %v537_v29, 0.0 }
 0x15d   : > { %578 = vadd.xlane.f32.xlu1 %v550_v42  ;;  %v821_v0 = vpop.xlane.xlu2 %820 }
 0x15e   : > { %1370 = vlog2.f32 %v821_v0  ;;  %v226_v0 = vadd.s32 112, %v1949_v44 }
 0x15f   : > { %v827_v17 = vpop.xlane.xlu1 %826 }
 0x160   : > { %1372 = vlog2.f32 %v827_v17  ;;  %vm244_vm0 = vcmp.eq.s32.totalorder %v226_v0, %v1951_v51 }
 0x161   : > { %v552_v44 = vsel %vm244_vm0, %v536_v15, 0.0 }
 0x164   : > { %576 = vadd.xlane.f32.xlu2 %v549_v6  ;;  %967 = vadd.xlane.f32.xlu0 %v942_v28  ;;  %v1371_v20 = vpop.eup %1370 }
 0x165   : > { %975 = vadd.xlane.f32.xlu1 %v946_v43  ;;  %v868_v10 = vmul.f32 0.6931472, %v1371_v20  ;;  %v433_v40 = vpop.xlane.xlu2 %432 }
 0x166   : > { %v1373_v24 = vpop.eup %1372 }
 0x167   : > { %v824_v4 = vpop.xlane.xlu0 %823  ;;  %v899_v53 = vadd.f32 %v868_v10, %v2577_v22  ;;  %v872_v21 = vmul.f32 0.6931472, %v1373_v24  ;;  %v436_v63 = vpop.xlane.xlu1 %435  ;;  %v932_v10 = vld [vmem:[%s1964_s16 + $0xf0] sm:$0xff]  ;;  %v551_v22 = vsel %vm243_vm14, %v535_v3, 0.0 }
 0x168   : > { %1374 = vlog2.f32 %v824_v4 }
 0x169   : > { %v981_v32 = vsub.f32 %v899_v53, %v2247_v16  ;;  %v901_v42 = vadd.f32 %v872_v21, %v2057_v62  ;;  %1376 = vlog2.f32 %v433_v40  ;;  %v931_v53 = vld [vmem:[%s1964_s16 + $0xe0] sm:$0xff] }
 0x16a   : > { %v947_v40 = vsel %vm244_vm0, %v931_v53, 0.0 }
 0x16b   : > { %v983_v35 = vsub.f32 %v901_v42, %v2309_v59  ;;  %v944_v59 = vsel %vm241_vm13, %v928_v47, 0.0  ;;  %v997_v43 = vsel %vm602_vm9, %v981_v32, 0.0 }
 0x16c   : > { %973 = vadd.xlane.f32.xlu2 %v945_v45  ;;  %574 = vadd.xlane.f32.xlu0 %v548_v33 }
 0x16d   : > { %584 = vadd.xlane.f32.xlu1 %v553_v56  ;;  %v1000_v4 = vsel %vm602_vm9, %v983_v35, 0.0 }
 0x16e   : > { %v1375_v18 = vpop.eup %1374 }
 0x16f   : > { %v870_v16 = vmul.f32 0.6931472, %v1375_v18  ;;  %v833_v26 = vpop.xlane.xlu2 %832  ;;  %v830_v62 = vpop.xlane.xlu0 %829 }
 0x170   : > { %v836_v17 = vpop.xlane.xlu1 %835  ;;  %1378 = vlog2.f32 %v833_v26  ;;  %v1377_v21 = vpop.eup %1376 }
 0x171   : > { %v900_v6 = vadd.f32 %v870_v16, %v2075_v13  ;;  %v477_v27 = vmul.f32 0.6931472, %v1377_v21  ;;  %1380 = vlog2.f32 %v830_v62 }
 0x172   : > { %1382 = vlog2.f32 %v436_v63 }
 0x173   : > { %v982_v28 = vsub.f32 %v900_v6, %v2194_v61  ;;  %v948_v61 = vsel %vm245_vm15, %v932_v10, 0.0  ;;  %v505_v30 = vadd.f32 %v477_v27, %v2022_v5  ;;  %1384 = vlog2.f32 %v836_v17 }
 0x174   : > { %582 = vadd.xlane.f32.xlu2 %v552_v44  ;;  %971 = vadd.xlane.f32.xlu0 %v944_v59 }
 0x175   : > { %v998_v20 = vsel %vm602_vm9, %v982_v28, 0.0 }
 0x176   : > { %v999_v7 = vadd.f32 %v998_v20, %v997_v43  ;;  %v1379_v32 = vpop.eup %1378 }
 0x177   : > { %v442_v24 = vpop.xlane.xlu2 %441  ;;  %v439_v13 = vpop.xlane.xlu0 %438  ;;  %v876_v56 = vmul.f32 0.6931472, %v1379_v32 }
 0x178   : > { %v2366_v29 = vpop.xlane.xlu1 %844  ;;  %v1001_v8 = vadd.f32 %v1000_v4, %v999_v7  ;;  %v1381_v59 = vpop.eup %1380  ;;  %1386 = vlog2.f32 %v439_v13 }
 0x179   : > { %v903_v35 = vadd.f32 %v876_v56, %v2095_v11  ;;  %v874_v5 = vmul.f32 0.6931472, %v1381_v59  ;;  %v1383_v11 = vpop.eup %1382  ;;  %1388 = vlog2.f32 %v442_v24 }
 0x17a   : > { %v1385_v43 = vpop.eup %1384  ;;  %v479_v4 = vmul.f32 0.6931472, %v1383_v11 }
 0x17b   : > { %v902_v20 = vadd.f32 %v874_v5, %v2073_v48  ;;  %v878_v63 = vmul.f32 0.6931472, %v1385_v43 }
 0x17c   : > { %979 = vadd.xlane.f32.xlu2 %v948_v61  ;;  %580 = vadd.xlane.f32.xlu0 %v551_v22  ;;  %v506_v32 = vadd.f32 %v479_v4, %v2003_v49 }
 0x17d   : > { %v904_v48 = vadd.f32 %v878_v63, %v2079_v14 }
 0x17e   : > { %v1387_v10 = vpop.eup %1386 }
 0x17f   : > { %v2374_v45 = vpop.xlane.xlu2 %444  ;;  %v839_v33 = vpop.xlane.xlu0 %838  ;;  %v481_v61 = vmul.f32 0.6931472, %v1387_v10 }
 0x180   : > { %v2376_v42 = vpop.xlane.xlu1 %450  ;;  %1390 = vlog2.f32 %v839_v33 }
 0x181   : > { %v507_v21 = vadd.f32 %v481_v61, %v2020_v25 }
 0x184   : > { %977 = vadd.xlane.f32.xlu0 %v947_v40  ;;  %v1389_v40 = vpop.eup %1388 }
 0x186   : > { %v1391_v10 = vpop.eup %1390 }
 0x187   : > { %v561_v18 = vpop.xlane.xlu2 %560  ;;  %v842_v15 = vpop.xlane.xlu0 %841 }
 0x188   : > { %v958_v47 = vpop.xlane.xlu1 %957  ;;  %v589_v16 = vsub.f32 %v505_v30, %v561_v18  ;;  %1392 = vlog2.f32 %v842_v15 }
 0x189   : > { %v985_v26 = vsub.f32 %v903_v35, %v958_v47  ;;  %v483_v47 = vmul.f32 0.6931472, %v1389_v40  ;;  %1394 = vlog2.f32 %v2366_v29 }
 0x18a   : > { %v608_v6 = vsel %vm602_vm9, %v589_v16, 0.0  ;;  %1396 = vlog2.f32 %v2374_v45 }
 0x18b   : > { %v609_v44 = vadd.f32 %v608_v6, %v2311_v19  ;;  %v1004_v13 = vsel %vm602_vm9, %v985_v26, 0.0  ;;  %v508_v49 = vadd.f32 %v483_v47, %v2034_v39  ;;  %v880_v39 = vmul.f32 0.6931472, %v1391_v10 }
 0x18f   : > { %v2384_v51 = vpop.xlane.xlu2 %847  ;;  %v448_v0 = vpop.xlane.xlu0 %447 }
 0x190   : > { %v565_v28 = vpop.xlane.xlu1 %564  ;;  %1398 = vlog2.f32 %v448_v0 }
 0x191   : > { %v591_v30 = vsub.f32 %v507_v21, %v565_v28  ;;  %1400 = vlog2.f32 %v2376_v42 }
 0x192   : > { %1402 = vlog2.f32 %v2384_v51 }
 0x193   : > { %v612_v25 = vsel %vm602_vm9, %v591_v30, 0.0 }
 0x197   : > { %v2387_v62 = vpop.xlane.xlu2 %453  ;;  %v956_v3 = vpop.xlane.xlu0 %955 }
 0x198   : > { %v2389_v7 = vpop.xlane.xlu1 %853  ;;  %v984_v19 = vsub.f32 %v902_v20, %v956_v3  ;;  %v1393_v3 = vpop.eup %1392  ;;  %1404 = vlog2.f32 %v2387_v62 }
 0x199   : > { %v882_v4 = vmul.f32 0.6931472, %v1393_v3  ;;  %v1395_v33 = vpop.eup %1394 }
 0x19a   : > { %v1002_v17 = vsel %vm602_vm9, %v984_v19, 0.0  ;;  %v1397_v61 = vpop.eup %1396 }
 0x19b   : > { %v1003_v22 = vadd.f32 %v1002_v17, %v1001_v8  ;;  %v906_v15 = vadd.f32 %v882_v4, %v2125_v36  ;;  %v905_v17 = vadd.f32 %v880_v39, %v2111_v58 }
 0x19d   : > { %v1005_v53 = vadd.f32 %v1004_v13, %v1003_v22  ;;  %v1399_v22 = vpop.eup %1398 }
 0x19e   : > { %v487_v45 = vmul.f32 0.6931472, %v1399_v22 }
 0x19f   : > { %v960_v27 = vpop.xlane.xlu2 %959  ;;  %v563_v56 = vpop.xlane.xlu0 %562 }
 0x1a0   : > { %v2396_v35 = vpop.xlane.xlu1 %459  ;;  %v986_v24 = vsub.f32 %v904_v48, %v960_v27  ;;  %v590_v18 = vsub.f32 %v506_v32, %v563_v56  ;;  %v884_v48 = vmul.f32 0.6931472, %v1395_v33  ;;  %v485_v32 = vmul.f32 0.6931472, %v1397_v61 }
 0x1a1   : > { %v510_v58 = vadd.f32 %v487_v45, %v2030_v37 }
 0x1a2   : > { %v1006_v8 = vsel %vm602_vm9, %v986_v24, 0.0  ;;  %v610_v16 = vsel %vm602_vm9, %v590_v18, 0.0  ;;  %v907_v30 = vadd.f32 %v884_v48, %v2097_v12  ;;  %v509_v24 = vadd.f32 %v485_v32, %v2032_v60  ;;  %v1401_v18 = vpop.eup %1400 }
 0x1a3   : > { %v1007_v26 = vadd.f32 %v1006_v8, %v1005_v53  ;;  %v611_v6 = vadd.f32 %v610_v16, %v609_v44  ;;  %v1403_v4 = vpop.eup %1402 }
 0x1a5   : > { %v613_v14 = vadd.f32 %v612_v25, %v611_v6  ;;  %v489_v25 = vmul.f32 0.6931472, %v1401_v18 }
 0x1a7   : > { %v567_v59 = vpop.xlane.xlu2 %566  ;;  %v2402_v5 = vpop.xlane.xlu0 %850  ;;  %v511_v12 = vadd.f32 %v489_v25, %v2043_v38 }
 0x1a8   : > { %v964_v28 = vpop.xlane.xlu1 %963  ;;  %v592_v11 = vsub.f32 %v508_v49, %v567_v59 }
 0x1a9   : > { %v988_v21 = vsub.f32 %v906_v15, %v964_v28 }
 0x1aa   : > { %v614_v43 = vsel %vm602_vm9, %v592_v11, 0.0 }
 0x1ab   : > { %v615_v20 = vadd.f32 %v614_v43, %v613_v14  ;;  %v1010_v27 = vsel %vm602_vm9, %v988_v21, 0.0 }
 0x1af   : > { %v2406_v44 = vpop.xlane.xlu2 %856  ;;  %v457_v19 = vpop.xlane.xlu0 %456 }
 0x1b0   : > { %v571_v63 = vpop.xlane.xlu1 %570  ;;  %1406 = vlog2.f32 %v457_v19 }
 0x1b1   : > { %v594_v42 = vsub.f32 %v510_v58, %v571_v63  ;;  %1408 = vlog2.f32 %v2389_v7 }
 0x1b2   : > { %1410 = vlog2.f32 %v2402_v5 }
 0x1b3   : > { %v618_v28 = vsel %vm602_vm9, %v594_v42, 0.0  ;;  %1412 = vlog2.f32 %v2396_v35 }
 0x1b4   : > { %1414 = vlog2.f32 %v2406_v44 }
 0x1b7   : > { %v463_v13 = vpop.xlane.xlu2 %462  ;;  %v962_v53 = vpop.xlane.xlu0 %961 }
 0x1b8   : > { %v987_v29 = vsub.f32 %v905_v17, %v962_v53  ;;  %v2414_v56 = vpop.xlane.xlu1 %862  ;;  %v1405_v53 = vpop.eup %1404  ;;  %1416 = vlog2.f32 %v463_v13 }
 0x1b9   : > { %v491_v48 = vmul.f32 0.6931472, %v1405_v53  ;;  %v1407_v32 = vpop.eup %1406 }
 0x1ba   : > { %v1008_v0 = vsel %vm602_vm9, %v987_v29, 0.0  ;;  %v1409_v62 = vpop.eup %1408 }
 0x1bb   : > { %v1009_v40 = vadd.f32 %v1008_v0, %v1007_v26  ;;  %v512_v45 = vadd.f32 %v491_v48, %v2041_v50  ;;  %v1411_v19 = vpop.eup %1410  ;;  %v493_v0 = vmul.f32 0.6931472, %v1407_v32 }
 0x1bc   : > { %v1413_v5 = vpop.eup %1412 }
 0x1bd   : > { %v1011_v36 = vadd.f32 %v1010_v27, %v1009_v40  ;;  %v890_v27 = vmul.f32 0.6931472, %v1409_v62  ;;  %v1415_v58 = vpop.eup %1414  ;;  %v513_v44 = vadd.f32 %v493_v0, %v2556_v46 }
 0x1bf   : > { %v966_v47 = vpop.xlane.xlu2 %965  ;;  %v569_v8 = vpop.xlane.xlu0 %568 }
 0x1c0   : > { %v989_v16 = vsub.f32 %v907_v30, %v966_v47  ;;  %v593_v6 = vsub.f32 %v509_v24, %v569_v8  ;;  %v469_v11 = vpop.xlane.xlu1 %468  ;;  %v1417_v30 = vpop.eup %1416  ;;  %v495_v24 = vmul.f32 0.6931472, %v1413_v5 }
 0x1c1   : > { %v497_v25 = vmul.f32 0.6931472, %v1417_v30 }
 0x1c2   : > { %v1012_v26 = vsel %vm602_vm9, %v989_v16, 0.0  ;;  %v616_v14 = vsel %vm602_vm9, %v593_v6, 0.0  ;;  %v910_v16 = vadd.f32 %v890_v27, %v2139_v2  ;;  %v892_v6 = vmul.f32 0.6931472, %v1415_v58 }
 0x1c3   : > { %v1013_v49 = vadd.f32 %v1012_v26, %v1011_v36  ;;  %v617_v59 = vadd.f32 %v616_v14, %v615_v20  ;;  %v886_v20 = vmul.f32 0.6931472, %v1403_v4  ;;  %v888_v36 = vmul.f32 0.6931472, %v1411_v19 }
 0x1c4   : > { %v514_v46 = vadd.f32 %v495_v24, %v2049_v52  ;;  %v515_v2 = vadd.f32 %v497_v25, %v2559_v34 }
 0x1c5   : > { %v619_v37 = vadd.f32 %v618_v28, %v617_v59  ;;  %v908_v15 = vadd.f32 %v886_v20, %v2131_v1  ;;  %v909_v8 = vadd.f32 %v888_v36, %v2180_v9  ;;  %v911_v9 = vadd.f32 %v892_v6, %v2192_v54 }
 0x1c7   : > { %v573_v60 = vpop.xlane.xlu2 %572  ;;  %v860_v43 = vpop.xlane.xlu0 %859 }
 0x1c8   : > { %v595_v10 = vsub.f32 %v511_v12, %v573_v60  ;;  %v2425_v61 = vpop.xlane.xlu1 %969 }
 0x1c9   : > { %v991_v14 = vsub.f32 %v909_v8, %v2425_v61 }
 0x1ca   : > { %v620_v3 = vsel %vm602_vm9, %v595_v10, 0.0 }
 0x1cb   : > { %v621_v39 = vadd.f32 %v620_v3, %v619_v37  ;;  %v1016_v10 = vsel %vm602_vm9, %v991_v14, 0.0 }
 0x1cf   : > { %v866_v63 = vpop.xlane.xlu2 %865  ;;  %v466_v33 = vpop.xlane.xlu0 %465 }
 0x1d0   : > { %v579_v21 = vpop.xlane.xlu1 %578  ;;  %1418 = vlog2.f32 %v466_v33 }
 0x1d1   : > { %1420 = vlog2.f32 %v469_v11  ;;  %v598_v12 = vsub.f32 %v514_v46, %v579_v21 }
 0x1d2   : > { %1422 = vlog2.f32 %v860_v43 }
 0x1d3   : > { %1424 = vlog2.f32 %v2414_v56 }
 0x1d4   : > { %1426 = vlog2.f32 %v866_v63 }
 0x1d6   : > { %v1419_v18 = vpop.eup %1418 }
 0x1d7   : > { %v577_v17 = vpop.xlane.xlu2 %576  ;;  %v968_v38 = vpop.xlane.xlu0 %967 }
 0x1d8   : > { %v990_v22 = vsub.f32 %v908_v15, %v968_v38  ;;  %v976_v35 = vpop.xlane.xlu1 %975  ;;  %v1421_v47 = vpop.eup %1420  ;;  %v597_v42 = vsub.f32 %v513_v44, %v577_v17  ;;  %v626_v15 = vsel %vm602_vm9, %v598_v12, 0.0 }
 0x1d9   : > { %v1423_v28 = vpop.eup %1422  ;;  %v501_v37 = vmul.f32 0.6931472, %v1421_v47 }
 0x1da   : > { %v1014_v51 = vsel %vm602_vm9, %v990_v22, 0.0  ;;  %v624_v56 = vsel %vm602_vm9, %v597_v42, 0.0  ;;  %v1425_v43 = vpop.eup %1424  ;;  %v894_v3 = vmul.f32 0.6931472, %v1423_v28 }
 0x1db   : > { %v1015_v29 = vadd.f32 %v1014_v51, %v1013_v49  ;;  %v499_v49 = vmul.f32 0.6931472, %v1419_v18  ;;  %v1427_v4 = vpop.eup %1426  ;;  %v517_v63 = vadd.f32 %v501_v37, %v2564_v23  ;;  %v896_v34 = vmul.f32 0.6931472, %v1425_v43 }
 0x1dc   : > { %v898_v51 = vmul.f32 0.6931472, %v1427_v4  ;;  %v912_v21 = vadd.f32 %v894_v3, %v2219_v55 }
 0x1dd   : > { %v1017_v61 = vadd.f32 %v1016_v10, %v1015_v29  ;;  %v913_v0 = vadd.f32 %v896_v34, %v2169_v57 }
 0x1df   : > { %v575_v1 = vpop.xlane.xlu0 %574  ;;  %v974_v7 = vpop.xlane.xlu2 %973 }
 0x1e0   : > { %v596_v40 = vsub.f32 %v512_v45, %v575_v1  ;;  %v585_v33 = vpop.xlane.xlu1 %584  ;;  %v993_v54 = vsub.f32 %v911_v9, %v974_v7  ;;  %v994_v1 = vsub.f32 %v912_v21, %v976_v35  ;;  %v914_v7 = vadd.f32 %v898_v51, %v2261_v31 }
 0x1e2   : > { %v622_v13 = vsel %vm602_vm9, %v596_v40, 0.0  ;;  %v1020_v23 = vsel %vm602_vm9, %v993_v54, 0.0  ;;  %v1022_v27 = vsel %vm602_vm9, %v994_v1, 0.0 }
 0x1e3   : > { %v623_v26 = vadd.f32 %v622_v13, %v621_v39  ;;  %v516_v39 = vadd.f32 %v499_v49, %v2572_v41  ;;  %v601_v41 = vsub.f32 %v517_v63, %v585_v33 }
 0x1e5   : > { %v625_v60 = vadd.f32 %v624_v56, %v623_v26  ;;  %v632_v40 = vsel %vm602_vm9, %v601_v41, 0.0 }
 0x1e7   : > { %v972_v50 = vpop.xlane.xlu0 %971  ;;  %v583_v11 = vpop.xlane.xlu2 %582  ;;  %v627_v53 = vadd.f32 %v626_v15, %v625_v60 }
 0x1e8   : > { %v992_v59 = vsub.f32 %v910_v16, %v972_v50  ;;  %v600_v17 = vsub.f32 %v516_v39, %v583_v11 }
 0x1ea   : > { %v1018_v52 = vsel %vm602_vm9, %v992_v59, 0.0  ;;  %v630_v29 = vsel %vm602_vm9, %v600_v17, 0.0 }
 0x1eb   : > { %v1019_v22 = vadd.f32 %v1018_v52, %v1017_v61 }
 0x1ed   : > { %v1021_v62 = vadd.f32 %v1020_v23, %v1019_v22 }
 0x1ef   : > { %v581_v20 = vpop.xlane.xlu0 %580  ;;  %v980_v45 = vpop.xlane.xlu2 %979  ;;  %v1023_v35 = vadd.f32 %v1022_v27, %v1021_v62 }
 0x1f0   : > { %v599_v38 = vsub.f32 %v515_v2, %v581_v20  ;;  %v996_v36 = vsub.f32 %v914_v7, %v980_v45 }
 0x1f2   : > { %v628_v48 = vsel %vm602_vm9, %v599_v38, 0.0  ;;  %v1026_v44 = vsel %vm602_vm9, %v996_v36, 0.0 }
 0x1f3   : > { %v629_v32 = vadd.f32 %v628_v48, %v627_v53 }
 0x1f5   : > { %v631_v19 = vadd.f32 %v630_v29, %v629_v32 }
 0x1f7   : > { %v978_v5 = vpop.xlane.xlu0 %977  ;;  %v633_v55 = vadd.f32 %v632_v40, %v631_v19 }
 0x1f8   : > { %v995_v58 = vsub.f32 %v913_v0, %v978_v5 }
 0x1f9   : > { %634 = vadd.xlane.f32.xlu0 %v633_v55 }
 0x1fa   : > { %v1024_v30 = vsel %vm602_vm9, %v995_v58, 0.0 }
 0x1fb   : > { %v1025_v24 = vadd.f32 %v1024_v30, %v1023_v35 }
 0x1fd   : > { %v1027_v13 = vadd.f32 %v1026_v44, %v1025_v24 }
 0x1ff   : > { %1028 = vadd.xlane.f32.xlu1 %v1027_v13 }
 0x26c   : > { %v635_v31 = vpop.xlane.xlu0 %634 }
 0x26d   : > { %v636_v57 = vrot.slane %v635_v31, 4 }
 0x26f   : > { %v637_v18 = vadd.f32 %v636_v57, %v635_v31 }
 0x271   : > { %v638_v50 = vrot.slane %v637_v18, 2 }
 0x272   : > { %v1029_v47 = vpop.xlane.xlu1 %1028 }
 0x273   : > { %v1030_v8 = vrot.slane %v1029_v47, 4  ;;  %v639_v42 = vadd.f32 %v638_v50, %v637_v18 }
 0x275   : > { %v1031_v16 = vadd.f32 %v1030_v8, %v1029_v47  ;;  %v640_v6 = vrot.slane %v639_v42, 1 }
 0x277   : > { %v1032_v25 = vrot.slane %v1031_v16, 2  ;;  %v641_v26 = vadd.f32 %v640_v6, %v639_v42 }
 0x279   : > { %v1033_v14 = vadd.f32 %v1032_v25, %v1031_v16  ;;  %1179 = vpush %v641_v26 }
 0x27b   : > { %v1034_v46 = vrot.slane %v1033_v14, 1 }
 0x27d   : > { %v1035_v49 = vadd.f32 %v1034_v46, %v1033_v14 }
 0x27f   : > { %1181 = vpush %v1035_v49 }
 0x2aa   : > { %s1180_s6 = spop %1179 }
 0x2b0   : > { %s1182_s7 = spop %1181 }
 0x2b1   : > { %s1037_s14 = sadd.f32 %s1182_s7, %s1180_s6 }
 0x2b3   : > { %v1038_v59 = vstv %s1037_s14 }
 0x2b4   : > { %1039 = vst [vmem:[%s207_s30] sm:$0xff] %v1038_v59 }
 0x2b5   : > { %1515 = shalt.err (!%p1512_p0)
}
 0x2b6   : > { %1187 = dma.vmem_to_hbm [thread:$0]  (%p1627_p11), %s1054_s24, 128, %s1056_s25, %s1041_s4  }
 0x2b7 PF: > { %s1067_s23 = sand.u32 1, %s1546_s9   ;;  %p2578_p1 = scmp.ge.s32.totalorder %s1558_s12, 2 }
 0x2b8   : > { %s1068_s17 = scalar_lea.sflag [#allocation4], %s1067_s23 }
 0x2b9   : > { %p1197_p4 = pnand %p2578_p1, %p1631_p12 }
 0x2bb   : > { %p1198_p7 = pneg %p1197_p4 }
 0x2bd   : > { %1541 = dma.done.wait (%p1198_p7), %s1068_s17, 128  }
 0x2be   : > { %1543 = vsyncadd (%p1198_p7), %s1068_s17, 4294967168  ;;  %p18_p5 = scmp.ge.s32.totalorder %s1602_s15, 4   ;;  %s2579_s9 = smov %s1550_s10 }
 0x2bf   : > { %s2580_s10 = smov %s1554_s11  ;;  %s2581_s11 = smov %s1614_s18 }
 0x2c0   : > { %s2582_s12 = smov %s1602_s15  ;;  %20 = sbr.rel (!%p18_p5) target bundleno = 7 (0x7), region = 88 }
 0x2c5   :  { %1074 = vsyncpa [#allocation3], 1 }
 0x2c6   :  { %1076 = vsyncpa [#allocation3 + $0x1], 1 }
 0x2c7   :  { %1077 = vsyncpa [#allocation6], 1 }
 0x2c8   :  { %1079 = vsyncpa [#allocation6 + $0x1], 1 }
 0x2c9   :  { %1080 = vsyncpa [#allocation4], 1 }
 0x2ca   :  { %1082 = vsyncpa [#allocation4 + $0x1], 1 }

</bundles_post_ra>
